<compile_context>
chip_gen: v6e
topology: v6e:2x2x1
jax: 0.10.0
libtpu: 0.0.40
codegen_flags: <defaults>
</compile_context>

<pallas_src>
from functools import partial
import random

import jax
import jax.numpy as jnp
from jax.experimental import pallas as pl
from jax.experimental.pallas import tpu as pltpu

DIM = 128         # MoCo feature dim (module default 128; multiple of 128 lanes)
K_QUEUE = 2048    # queue size (module default 65536, small for demo)
M_MOM = 0.999
TEMP = 0.07
ALPHA = 0.5
DIFF_SPEED = [2]

# Per-half queue K-tile cap.  At production K=65536 each half is 32768 and the
# tile becomes 16384 lanes: bf16 128x16384 = 4 MiB (8 MiB double-buffered) plus
# a 1 MiB f32 output tile (2 MiB double-buffered) -- well inside the 32 MiB
# scoped VMEM on every chip (v7x physical VMEM is only 64 MiB, so we do not
# raise the limit further).
MAX_QUEUE_TILE = 16384
VMEM_LIMIT_BYTES = 32 * 1024 * 1024


# ----------------------------- Pallas kernel ------------------------------

def _l2norm(x):
    # torch.nn.functional.normalize(x, dim=-1, eps=1e-12) ==
    # x / max(||x||, eps) == x * rsqrt(max(sum(x^2), eps^2)).
    # rsqrt goes to the EUP slot (otherwise idle) instead of a VALU divide.
    ss = jnp.sum(x * x, axis=-1, keepdims=True)
    return x * jax.lax.rsqrt(jnp.maximum(ss, jnp.float32(1e-24)))


def _fused_moco_kernel(qf_ref, kskf_ref, wq_ref, bq_ref, wk_ref, bk_ref,
                       queue_ref, lneg_ref, kn_ref, side_ref, qn_vmem):
    """Fused MoCo head.

    grid = (2, jtiles); axis 0 "parallel" (queue half / TensorCore),
    axis 1 "arbitrary" (K tiles within the half, qn scratch carries).

    Inputs (bf16 features/weights, f32 biases, bf16 queue tile):
      qf   (NP, F), kskf (2NP, F) = stacked [key ; speed_key] features,
      wq/wk (F, D), bq/bk (1, D), queue tile (D, TK).
    Outputs:
      lneg (NP, TK)     l_neg tile, already divided by T (f32)
      kn   (1, NP, D)   normalized key features (f32, one copy per half)
      side (1, NP, 128) lane-dense: col0 = l_pos/T, col1 = l_neg_speed/T
    Scratch:
      qn_vmem (NP, D) bf16 -- normalized q, persists across the K tiles.
    """
    inv_t = jnp.float32(1.0 / TEMP)

    @pl.when(pl.program_id(1) == 0)
    def _prologue():
        # bf16 x bf16 -> f32 MXU matmuls (bf16-native on v5e; halves weight DMA)
        q = jnp.dot(qf_ref[...], wq_ref[...],
                    preferred_element_type=jnp.float32) + bq_ref[...]
        ksk = jnp.dot(kskf_ref[...], wk_ref[...],
                      preferred_element_type=jnp.float32) + bk_ref[...]
        np_rows = q.shape[0]
        qn = _l2norm(q)
        kn = _l2norm(ksk[:np_rows])
        skn = _l2norm(ksk[np_rows:])

        l_pos = jnp.sum(qn * kn, axis=-1, keepdims=True) * inv_t        # (NP,1)
        l_neg_speed = jnp.sum(qn * skn, axis=-1, keepdims=True) * inv_t  # (NP,1)

        lane = jax.lax.broadcasted_iota(jnp.int32, side_ref.shape[1:], 1)
        side_ref[0] = jnp.where(lane == 0, l_pos,
                                jnp.where(lane == 1, l_neg_speed,
                                          jnp.float32(0.0)))
        kn_ref[0] = kn
        qn_vmem[...] = qn.astype(jnp.bfloat16)

    # Dominant (memory-bound) work: qn @ queue_tile / T every grid step.
    lneg_ref[...] = (
        jnp.dot(qn_vmem[...], queue_ref[...],
                preferred_element_type=jnp.float32) * inv_t)


def _pick_queue_tile(half_k, cap):
    tk = min(half_k, cap)
    tk -= tk % 128
    tk = max(tk, 128)
    while half_k % tk:
        tk -= 128
    return tk


def pallas_moco_fused(q_feat_bf16, ksk_feat_bf16, wq, bq, wk, bk, queue_bf16):
    npad, f = q_feat_bf16.shape
    d = wq.shape[1]
    kq = queue_bf16.shape[1]
    assert kq % 256 == 0, "queue size must split into two 128-aligned halves"
    half = kq // 2
    tk = _pick_queue_tile(half, MAX_QUEUE_TILE)
    jtiles = half // tk

    def queue_map(i, j):
        return (0, i * jtiles + j)

    out_shapes = (
        jax.ShapeDtypeStruct((npad, kq), jnp.float32),     # l_neg (already /T)
        jax.ShapeDtypeStruct((2, npad, d), jnp.float32),   # kn (per half)
        jax.ShapeDtypeStruct((2, npad, 128), jnp.float32), # side (per half)
    )
    lneg, kn2, side2 = pl.pallas_call(
        _fused_moco_kernel,
        out_shape=out_shapes,
        grid=(2, jtiles),
        in_specs=[
            pl.BlockSpec((npad, f), lambda i, j: (0, 0)),
            pl.BlockSpec((2 * npad, f), lambda i, j: (0, 0)),
            pl.BlockSpec((f, d), lambda i, j: (0, 0)),
            pl.BlockSpec((1, d), lambda i, j: (0, 0)),
            pl.BlockSpec((f, d), lambda i, j: (0, 0)),
            pl.BlockSpec((1, d), lambda i, j: (0, 0)),
            pl.BlockSpec((d, tk), queue_map),
        ],
        out_specs=(
            pl.BlockSpec((npad, tk), queue_map),
            pl.BlockSpec((1, npad, d), lambda i, j: (i, 0, 0)),
            pl.BlockSpec((1, npad, 128), lambda i, j: (i, 0, 0)),
        ),
        scratch_shapes=[pltpu.VMEM((npad, d), jnp.bfloat16)],
        compiler_params=pltpu.CompilerParams(
            dimension_semantics=("parallel", "arbitrary"),
            vmem_limit_bytes=VMEM_LIMIT_BYTES),
    )(q_feat_bf16, ksk_feat_bf16, wq, bq.reshape(1, d), wk, bk.reshape(1, d),
      queue_bf16)
    # Both halves compute identical kn/side; take half 0.
    return lneg, kn2[0], side2[0]


# ------------------------------- JAX glue ---------------------------------

def encoder_features(video):
    """Synthetic base_encoder trunk: mean-pool over time, flatten."""
    feat = jnp.mean(video, axis=2)              # (B, C, H, W)
    return feat.reshape(feat.shape[0], -1)      # (B, C*H*W)


def momentum_update(params_q, params_k, m):
    return jax.tree_util.tree_map(
        lambda pk, pq: pk * m + pq * (1.0 - m), params_k, params_q)


def diff_speed_select(key, im_q, im_k, ds, alpha):
    """JAX port of MoCoDiffLoss._diff_speed frame selection (jit-safe glue)."""
    b, c, t, h, w = im_q.shape
    perm = jax.random.permutation(key, b)
    n1 = int(b * alpha)
    sel1, sel2 = perm[:n1], perm[n1:]
    t_real = t // ds
    speed1 = jnp.arange(0, t, 1)[:t_real]
    speed2 = jnp.arange(0, t, ds)[:t_real]

    im_q_real = jnp.zeros((b, c, t_real, h, w), im_q.dtype)
    im_k_real = jnp.zeros_like(im_q_real)
    im_k_neg = jnp.zeros_like(im_q_real)

    im_q_real = im_q_real.at[sel1].set(im_q[sel1][:, :, speed1])
    im_q_real = im_q_real.at[sel2].set(im_q[sel2][:, :, speed2])
    im_k_real = im_k_real.at[sel1].set(im_k[sel1][:, :, speed1])
    im_k_real = im_k_real.at[sel2].set(im_k[sel2][:, :, speed2])
    im_k_neg = im_k_neg.at[sel1].set(im_k[sel1][:, :, speed2])
    im_k_neg = im_k_neg.at[sel2].set(im_k[sel2][:, :, speed1])
    return im_q_real, im_k_real, im_k_neg


def dequeue_and_enqueue(queue, queue_ptr, keys_normed):
    """Traced (jit-safe) queue update.  With the state donated to the jit,
    XLA performs this dynamic_update_slice in place (no full-queue rewrite)."""
    bsz = keys_normed.shape[0]
    assert queue.shape[1] % bsz == 0
    ptr = queue_ptr[0]                                   # traced int32 scalar
    queue = jax.lax.dynamic_update_slice(
        queue, keys_normed.T.astype(queue.dtype), (0, ptr))
    new_ptr = (ptr + bsz) % queue.shape[1]
    return queue, new_ptr.reshape(1).astype(jnp.int32)


def _pad_rows(x, np_rows):
    pad = np_rows - x.shape[0]
    if pad == 0:
        return x
    return jnp.pad(x, ((0, pad), (0, 0)))


@partial(jax.jit, static_argnames=("diff_speed",), donate_argnums=(0,))
def moco_diff_loss_forward(state, im_q, im_k, rng, diff_speed):
    # momentum update of key encoder (no-grad elementwise glue)
    params_q = state["params_q"]
    params_k = momentum_update(params_q, state["params_k"], M_MOM)

    im_q_r, im_k_r, im_k_neg = diff_speed_select(
        rng, im_q, im_k, diff_speed, ALPHA)

    # Single-device semantics: concat_all_gather is identity and the DDP batch
    # shuffle / unshuffle cancel exactly (synthetic encoder has no BatchNorm),
    # so _forward_encoder_k == encoder_k + normalize.
    q_feat = encoder_features(im_q_r)
    k_feat = encoder_features(im_k_r)
    sk_feat = encoder_features(im_k_neg)

    n = q_feat.shape[0]
    npad = ((n + 15) // 16) * 16               # bf16 (16,128) sublane packing
    q_feat_p = _pad_rows(q_feat, npad).astype(jnp.bfloat16)
    ksk_feat = jnp.concatenate(
        [_pad_rows(k_feat, npad), _pad_rows(sk_feat, npad)],
        axis=0).astype(jnp.bfloat16)

    # bf16 weights: halves the weight DMA and uses the bf16-native MXU on v5e;
    # biases stay f32 (added after f32 accumulation).
    wq_b = params_q["w"].astype(jnp.bfloat16)
    wk_b = params_k["w"].astype(jnp.bfloat16)

    l_neg_full, kn_pad, side = pallas_moco_fused(
        q_feat_p, ksk_feat, wq_b, params_q["b"], wk_b, params_k["b"],
        state["queue"])

    l_pos = side[:n, 0:1]          # (N, 1), already /T
    l_neg_speed = side[:n, 1:2]    # (N, 1), already /T
    l_neg = l_neg_full[:n]         # (N, K), already /T
    k_norm = kn_pad[:n]

    # TODO(synk): these two concatenates rewrite the (N, 1+K) logits in HBM; a
    # production loss should consume (l_pos, l_neg_speed, l_neg) directly
    # (cross-entropy with label 0 == -l_pos + logaddexp(l_pos, logsumexp(l_neg)))
    # -- kept here only to preserve the module's return signature.
    logits1 = jnp.concatenate([l_pos, l_neg], axis=1)
    logits2 = jnp.concatenate([l_neg_speed, l_neg], axis=1)
    # torch.long is int64; TPU/JAX default is int32 (x64 disabled).
    labels = jnp.zeros((n,), dtype=jnp.int32)
    ranking_logits = (l_pos, l_neg_speed)
    # TODO(synk): torch.ones_like(labels) is an integer target; cast to float
    # +/-1 before feeding a MarginRankingLoss downstream.
    ranking_target = jnp.ones_like(labels)

    new_queue, new_ptr = dequeue_and_enqueue(
        state["queue"], state["queue_ptr"], k_norm)

    new_state = {
        "params_q": params_q,
        "params_k": params_k,
        "queue": new_queue,
        "queue_ptr": new_ptr,
    }
    return (logits1, logits2), labels, ranking_logits, ranking_target, new_state


# --------------------------------- main ------------------------------------

if __name__ == "__main__":
    key = jax.random.PRNGKey(0)
    kq, kk, kw, kqueue, krun = jax.random.split(key, 5)

    B, C, T, H, W = 8, 3, 8, 16, 16
    im_q = jax.random.normal(kq, (B, C, T, H, W), jnp.float32)
    im_k = jax.random.normal(kk, (B, C, T, H, W), jnp.float32)

    F_in = C * H * W
    params_q = {
        "w": jax.random.normal(kw, (F_in, DIM), jnp.float32) * 0.02,
        "b": jnp.zeros((DIM,), jnp.float32),
    }
    # encoder_k initialized as an exact copy of encoder_q (as in __init__)
    params_k = jax.tree_util.tree_map(lambda x: x + 0.0, params_q)

    queue = jax.random.normal(kqueue, (DIM, K_QUEUE), jnp.float32)
    queue = queue / jnp.maximum(
        jnp.linalg.norm(queue, axis=0, keepdims=True), 1e-12)
    # Queue kept in bf16: halves HBM traffic of the dominant l_neg matmul;
    # f32 accumulation preserves logits precision for the contrastive loss.
    # TODO(synk): on v7x an fp8(e4m3) queue would halve the stream again;
    # validate logit error against the 1/T=14.3 scaling before adopting.
    queue = queue.astype(jnp.bfloat16)

    state = {
        "params_q": params_q,
        "params_k": params_k,
        "queue": queue,
        "queue_ptr": jnp.zeros((1,), jnp.int32),
    }

    # Host-side speed choice (mirrors PyTorch's random.choice); static shape
    # argument so the rest of the forward stays fully jitted.
    ds = random.Random(0).choice(DIFF_SPEED)

    (logits1, logits2), labels, ranking_logits, ranking_target, state = (
        moco_diff_loss_forward(state, im_q, im_k, krun, ds))

    jax.block_until_ready(
        (logits1, logits2, labels, ranking_logits, ranking_target,
         state["queue"], state["queue_ptr"]))

    assert logits1.shape == (B, 1 + K_QUEUE)
    assert logits2.shape == (B, 1 + K_QUEUE)
    assert labels.shape == (B,)
    assert ranking_logits[0].shape == (B, 1) and ranking_logits[1].shape == (B, 1)
    assert int(state["queue_ptr"][0]) == B % K_QUEUE
    print("KERNEL_OK")
</pallas_src>

<mosaic_0001>
module attributes {stable_mosaic.version = 11 : i64} {
  func.func @_fused_moco_kernel(%arg0: i32, %arg1: i32, %arg2: memref<16x768xbf16, #tpu.memory_space<vmem>>, %arg3: memref<32x768xbf16, #tpu.memory_space<vmem>>, %arg4: memref<768x128xbf16, #tpu.memory_space<vmem>>, %arg5: memref<1x128xf32, #tpu.memory_space<vmem>>, %arg6: memref<768x128xbf16, #tpu.memory_space<vmem>>, %arg7: memref<1x128xf32, #tpu.memory_space<vmem>>, %arg8: memref<128x1024xbf16, #tpu.memory_space<vmem>>, %arg9: memref<16x1024xf32, #tpu.memory_space<vmem>>, %arg10: memref<1x16x128xf32, #tpu.memory_space<vmem>>, %arg11: memref<1x16x128xf32, #tpu.memory_space<vmem>>, %arg12: memref<16x128xbf16, #tpu.memory_space<vmem>>) attributes {dimension_semantics = [#tpu.dimension_semantics<parallel>, #tpu.dimension_semantics<arbitrary>], iteration_bounds = array<i64: 2, 1>, scalar_prefetch = 0 : i64, scratch_operands = 1 : i64, tpu.core_type = #tpu.core_type<tc>, window_params = [{pipeline_mode = #tpu.pipeline_mode<synchronous>, transform_indices = @transform_0, window_bounds = array<i64: 16, 768>}, {pipeline_mode = #tpu.pipeline_mode<synchronous>, transform_indices = @transform_1, window_bounds = array<i64: 32, 768>}, {pipeline_mode = #tpu.pipeline_mode<synchronous>, transform_indices = @transform_2, window_bounds = array<i64: 768, 128>}, {pipeline_mode = #tpu.pipeline_mode<synchronous>, transform_indices = @transform_3, window_bounds = array<i64: 1, 128>}, {pipeline_mode = #tpu.pipeline_mode<synchronous>, transform_indices = @transform_4, window_bounds = array<i64: 768, 128>}, {pipeline_mode = #tpu.pipeline_mode<synchronous>, transform_indices = @transform_5, window_bounds = array<i64: 1, 128>}, {transform_indices = @transform_6, window_bounds = array<i64: 128, 1024>}, {transform_indices = @transform_7, window_bounds = array<i64: 16, 1024>}, {transform_indices = @transform_8, window_bounds = array<i64: 1, 16, 128>}, {transform_indices = @transform_9, window_bounds = array<i64: 1, 16, 128>}]} {
    %c0_i32 = arith.constant 0 : i32
    %0 = arith.cmpi eq, %arg1, %c0_i32 : i32
    %1 = arith.extui %0 : i1 to i32
    %cst = arith.constant 14.2857141 : f32
    %c0_i32_0 = arith.constant 0 : i32
    %2 = arith.cmpi ne, %1, %c0_i32_0 : i32
    scf.if %2 {
      %c0_8 = arith.constant 0 : index
      %c0_9 = arith.constant 0 : index
      %9 = vector.load %arg2[%c0_8, %c0_9] : memref<16x768xbf16, #tpu.memory_space<vmem>>, vector<16x768xbf16>
      %c0_10 = arith.constant 0 : index
      %c0_11 = arith.constant 0 : index
      %10 = vector.load %arg4[%c0_10, %c0_11] : memref<768x128xbf16, #tpu.memory_space<vmem>>, vector<768x128xbf16>
      %cst_12 = arith.constant dense<0.000000e+00> : vector<16x128xf32>
      %11 = tpu.matmul %9, %10, %cst_12 {dimension_numbers = #tpu.dot_dimension_numbers<[1], [0], [0], [1], [0, 0, 1, 1], [], []>} : vector<16x768xbf16>, vector<768x128xbf16>, vector<16x128xf32> -> vector<16x128xf32>
      %c0_13 = arith.constant 0 : index
      %c0_14 = arith.constant 0 : index
      %12 = vector.load %arg5[%c0_13, %c0_14] : memref<1x128xf32, #tpu.memory_space<vmem>>, vector<1x128xf32>
      %13 = vector.broadcast %12 : vector<1x128xf32> to vector<16x128xf32>
      %14 = arith.addf %11, %13 : vector<16x128xf32>
      %c0_15 = arith.constant 0 : index
      %c0_16 = arith.constant 0 : index
      %15 = vector.load %arg3[%c0_15, %c0_16] : memref<32x768xbf16, #tpu.memory_space<vmem>>, vector<32x768xbf16>
      %c0_17 = arith.constant 0 : index
      %c0_18 = arith.constant 0 : index
      %16 = vector.load %arg6[%c0_17, %c0_18] : memref<768x128xbf16, #tpu.memory_space<vmem>>, vector<768x128xbf16>
      %cst_19 = arith.constant dense<0.000000e+00> : vector<32x128xf32>
      %17 = tpu.matmul %15, %16, %cst_19 {dimension_numbers = #tpu.dot_dimension_numbers<[1], [0], [0], [1], [0, 0, 1, 1], [], []>} : vector<32x768xbf16>, vector<768x128xbf16>, vector<32x128xf32> -> vector<32x128xf32>
      %c0_20 = arith.constant 0 : index
      %c0_21 = arith.constant 0 : index
      %18 = vector.load %arg7[%c0_20, %c0_21] : memref<1x128xf32, #tpu.memory_space<vmem>>, vector<1x128xf32>
      %19 = vector.broadcast %18 : vector<1x128xf32> to vector<32x128xf32>
      %20 = arith.addf %17, %19 : vector<32x128xf32>
      %21 = arith.mulf %14, %14 : vector<16x128xf32>
      %cst_22 = arith.constant dense<0.000000e+00> : vector<16xf32>
      %22 = vector.multi_reduction <add>, %21, %cst_22 [1] : vector<16x128xf32> to vector<16xf32>
      %23 = vector.shape_cast %22 : vector<16xf32> to vector<16x1xf32>
      %cst_23 = arith.constant 1.000000e-24 : f32
      %24 = vector.broadcast %cst_23 : f32 to vector<16x1xf32>
      %25 = arith.maximumf %23, %24 : vector<16x1xf32>
      %26 = math.rsqrt %25 : vector<16x1xf32>
      %27 = vector.broadcast %26 : vector<16x1xf32> to vector<16x128xf32>
      %28 = arith.mulf %14, %27 : vector<16x128xf32>
      %29 = vector.extract_strided_slice %20 {offsets = [0, 0], sizes = [16, 128], strides = [1, 1]} : vector<32x128xf32> to vector<16x128xf32>
      %30 = arith.mulf %29, %29 : vector<16x128xf32>
      %cst_24 = arith.constant dense<0.000000e+00> : vector<16xf32>
      %31 = vector.multi_reduction <add>, %30, %cst_24 [1] : vector<16x128xf32> to vector<16xf32>
      %32 = vector.shape_cast %31 : vector<16xf32> to vector<16x1xf32>
      %cst_25 = arith.constant 1.000000e-24 : f32
      %33 = vector.broadcast %cst_25 : f32 to vector<16x1xf32>
      %34 = arith.maximumf %32, %33 : vector<16x1xf32>
      %35 = math.rsqrt %34 : vector<16x1xf32>
      %36 = vector.broadcast %35 : vector<16x1xf32> to vector<16x128xf32>
      %37 = arith.mulf %29, %36 : vector<16x128xf32>
      %38 = vector.extract_strided_slice %20 {offsets = [16, 0], sizes = [16, 128], strides = [1, 1]} : vector<32x128xf32> to vector<16x128xf32>
      %39 = arith.mulf %38, %38 : vector<16x128xf32>
      %cst_26 = arith.constant dense<0.000000e+00> : vector<16xf32>
      %40 = vector.multi_reduction <add>, %39, %cst_26 [1] : vector<16x128xf32> to vector<16xf32>
      %41 = vector.shape_cast %40 : vector<16xf32> to vector<16x1xf32>
      %cst_27 = arith.constant 1.000000e-24 : f32
      %42 = vector.broadcast %cst_27 : f32 to vector<16x1xf32>
      %43 = arith.maximumf %41, %42 : vector<16x1xf32>
      %44 = math.rsqrt %43 : vector<16x1xf32>
      %45 = vector.broadcast %44 : vector<16x1xf32> to vector<16x128xf32>
      %46 = arith.mulf %38, %45 : vector<16x128xf32>
      %47 = arith.mulf %28, %37 : vector<16x128xf32>
      %cst_28 = arith.constant dense<0.000000e+00> : vector<16xf32>
      %48 = vector.multi_reduction <add>, %47, %cst_28 [1] : vector<16x128xf32> to vector<16xf32>
      %49 = vector.shape_cast %48 : vector<16xf32> to vector<16x1xf32>
      %50 = vector.broadcast %cst : f32 to vector<16x1xf32>
      %51 = arith.mulf %49, %50 : vector<16x1xf32>
      %52 = arith.mulf %28, %46 : vector<16x128xf32>
      %cst_29 = arith.constant dense<0.000000e+00> : vector<16xf32>
      %53 = vector.multi_reduction <add>, %52, %cst_29 [1] : vector<16x128xf32> to vector<16xf32>
      %54 = vector.shape_cast %53 : vector<16xf32> to vector<16x1xf32>
      %55 = vector.broadcast %cst : f32 to vector<16x1xf32>
      %56 = arith.mulf %54, %55 : vector<16x1xf32>
      %57 = tpu.iota {dimensions = array<i32: 1>} : vector<16x128xi32>
      %c0_i32_30 = arith.constant 0 : i32
      %58 = vector.broadcast %c0_i32_30 : i32 to vector<16x128xi32>
      %59 = arith.cmpi eq, %57, %58 : vector<16x128xi32>
      %c1_i32 = arith.constant 1 : i32
      %60 = vector.broadcast %c1_i32 : i32 to vector<16x128xi32>
      %61 = arith.cmpi eq, %57, %60 : vector<16x128xi32>
      %cst_31 = arith.constant 0.000000e+00 : f32
      %62 = vector.shape_cast %56 : vector<16x1xf32> to vector<16x1xf32>
      %63 = vector.broadcast %62 : vector<16x1xf32> to vector<16x128xf32>
      %64 = vector.broadcast %cst_31 : f32 to vector<16x128xf32>
      %65 = arith.select %61, %63, %64 : vector<16x128xi1>, vector<16x128xf32>
      %66 = vector.shape_cast %51 : vector<16x1xf32> to vector<16x1xf32>
      %67 = vector.broadcast %66 : vector<16x1xf32> to vector<16x128xf32>
      %68 = arith.select %59, %67, %65 : vector<16x128xi1>, vector<16x128xf32>
      %c0_32 = arith.constant 0 : index
      %c0_33 = arith.constant 0 : index
      %c0_34 = arith.constant 0 : index
      %69 = vector.load %arg11[%c0_32, %c0_33, %c0_34] : memref<1x16x128xf32, #tpu.memory_space<vmem>>, vector<1x16x128xf32>
      %70 = vector.shape_cast %69 : vector<1x16x128xf32> to vector<16x128xf32>
      %71 = vector.shape_cast %68 : vector<16x128xf32> to vector<1x16x128xf32>
      tpu.vector_store %arg11[%c0_32, %c0_33, %c0_34], %71 {strides = array<i32>} : memref<1x16x128xf32, #tpu.memory_space<vmem>>, vector<1x16x128xf32>,
      %c0_35 = arith.constant 0 : index
      %c0_36 = arith.constant 0 : index
      %c0_37 = arith.constant 0 : index
      %72 = vector.load %arg10[%c0_35, %c0_36, %c0_37] : memref<1x16x128xf32, #tpu.memory_space<vmem>>, vector<1x16x128xf32>
      %73 = vector.shape_cast %72 : vector<1x16x128xf32> to vector<16x128xf32>
      %74 = vector.shape_cast %37 : vector<16x128xf32> to vector<1x16x128xf32>
      tpu.vector_store %arg10[%c0_35, %c0_36, %c0_37], %74 {strides = array<i32>} : memref<1x16x128xf32, #tpu.memory_space<vmem>>, vector<1x16x128xf32>,
      %75 = arith.truncf %28 : vector<16x128xf32> to vector<16x128xbf16>
      %c0_38 = arith.constant 0 : index
      %c0_39 = arith.constant 0 : index
      %76 = vector.load %arg12[%c0_38, %c0_39] : memref<16x128xbf16, #tpu.memory_space<vmem>>, vector<16x128xbf16>
      tpu.vector_store %arg12[%c0_38, %c0_39], %75 {strides = array<i32>} : memref<16x128xbf16, #tpu.memory_space<vmem>>, vector<16x128xbf16>,
    } else {
    }
    %c0 = arith.constant 0 : index
    %c0_1 = arith.constant 0 : index
    %3 = vector.load %arg12[%c0, %c0_1] : memref<16x128xbf16, #tpu.memory_space<vmem>>, vector<16x128xbf16>
    %c0_2 = arith.constant 0 : index
    %c0_3 = arith.constant 0 : index
    %4 = vector.load %arg8[%c0_2, %c0_3] : memref<128x1024xbf16, #tpu.memory_space<vmem>>, vector<128x1024xbf16>
    %cst_4 = arith.constant dense<0.000000e+00> : vector<16x1024xf32>
    %5 = tpu.matmul %3, %4, %cst_4 {dimension_numbers = #tpu.dot_dimension_numbers<[1], [0], [0], [1], [0, 0, 1, 1], [], []>} : vector<16x128xbf16>, vector<128x1024xbf16>, vector<16x1024xf32> -> vector<16x1024xf32>
    %cst_5 = arith.constant 14.2857141 : f32
    %6 = vector.broadcast %cst_5 : f32 to vector<16x1024xf32>
    %7 = arith.mulf %5, %6 : vector<16x1024xf32>
    %c0_6 = arith.constant 0 : index
    %c0_7 = arith.constant 0 : index
    %8 = vector.load %arg9[%c0_6, %c0_7] : memref<16x1024xf32, #tpu.memory_space<vmem>>, vector<16x1024xf32>
    tpu.vector_store %arg9[%c0_6, %c0_7], %7 {strides = array<i32>} : memref<16x1024xf32, #tpu.memory_space<vmem>>, vector<16x1024xf32>,
    return
  }
  func.func @transform_0(%arg0: i32, %arg1: i32) -> (i32, i32) {
    %c0_i32 = arith.constant 0 : i32
    %c0_i32_0 = arith.constant 0 : i32
    %c0_i32_1 = arith.constant 0 : i32
    return %c0_i32, %c0_i32_0 : i32, i32
  }
  func.func @transform_1(%arg0: i32, %arg1: i32) -> (i32, i32) {
    %c0_i32 = arith.constant 0 : i32
    %c0_i32_0 = arith.constant 0 : i32
    %c0_i32_1 = arith.constant 0 : i32
    return %c0_i32, %c0_i32_0 : i32, i32
  }
  func.func @transform_2(%arg0: i32, %arg1: i32) -> (i32, i32) {
    %c0_i32 = arith.constant 0 : i32
    %c0_i32_0 = arith.constant 0 : i32
    %c0_i32_1 = arith.constant 0 : i32
    return %c0_i32, %c0_i32_0 : i32, i32
  }
  func.func @transform_3(%arg0: i32, %arg1: i32) -> (i32, i32) {
    %c0_i32 = arith.constant 0 : i32
    %c0_i32_0 = arith.constant 0 : i32
    %c0_i32_1 = arith.constant 0 : i32
    return %c0_i32, %c0_i32_0 : i32, i32
  }
  func.func @transform_4(%arg0: i32, %arg1: i32) -> (i32, i32) {
    %c0_i32 = arith.constant 0 : i32
    %c0_i32_0 = arith.constant 0 : i32
    %c0_i32_1 = arith.constant 0 : i32
    return %c0_i32, %c0_i32_0 : i32, i32
  }
  func.func @transform_5(%arg0: i32, %arg1: i32) -> (i32, i32) {
    %c0_i32 = arith.constant 0 : i32
    %c0_i32_0 = arith.constant 0 : i32
    %c0_i32_1 = arith.constant 0 : i32
    return %c0_i32, %c0_i32_0 : i32, i32
  }
  func.func @transform_6(%arg0: i32, %arg1: i32) -> (i32, i32) {
    %c1_i32 = arith.constant 1 : i32
    %0 = arith.muli %arg0, %c1_i32 : i32
    %1 = arith.addi %0, %arg1 : i32
    %c0_i32 = arith.constant 0 : i32
    %c0_i32_0 = arith.constant 0 : i32
    return %c0_i32, %1 : i32, i32
  }
  func.func @transform_7(%arg0: i32, %arg1: i32) -> (i32, i32) {
    %c1_i32 = arith.constant 1 : i32
    %0 = arith.muli %arg0, %c1_i32 : i32
    %1 = arith.addi %0, %arg1 : i32
    %c0_i32 = arith.constant 0 : i32
    %c0_i32_0 = arith.constant 0 : i32
    return %c0_i32, %1 : i32, i32
  }
  func.func @transform_8(%arg0: i32, %arg1: i32) -> (i32, i32, i32) {
    %c0_i32 = arith.constant 0 : i32
    %c0_i32_0 = arith.constant 0 : i32
    %c0_i32_1 = arith.constant 0 : i32
    return %arg0, %c0_i32, %c0_i32_0 : i32, i32, i32
  }
  func.func @transform_9(%arg0: i32, %arg1: i32) -> (i32, i32, i32) {
    %c0_i32 = arith.constant 0 : i32
    %c0_i32_0 = arith.constant 0 : i32
    %c0_i32_1 = arith.constant 0 : i32
    return %arg0, %c0_i32, %c0_i32_0 : i32, i32, i32
  }
}

</mosaic_0001>

<bundles_post_ra>
// kernel: moco_diff_loss_forward.1
= control target key start
LH: loop header
LB: loop body
LE: loop exit
PB: predicated region body
PF: predicated region fallthrough
CT: control target
= control target key end

     0   :  { %s3176_s30 = smov 0   ;;  %s3178_s10 = smov 0   ;;  %s3915_s0 = inlined_call_operand.vmem [shape: bf16[16,768], index: 0, kind: input, shape index: {}]   ;;  %s3916_s1 = inlined_call_operand.vmem [shape: bf16[32,768], index: 1, kind: input, shape index: {}]   ;;  %s3917_s2 = inlined_call_operand.vmem [shape: bf16[768,128], index: 2, kind: input, shape index: {}]   ;;  %s3918_s3 = inlined_call_operand.vmem [shape: f32[1,128], index: 3, kind: input, shape index: {}]   ;;  %s3919_s4 = inlined_call_operand.vmem [shape: bf16[768,128], index: 4, kind: input, shape index: {}]   ;;  %s3920_s5 = inlined_call_operand.vmem [shape: f32[1,128], index: 5, kind: input, shape index: {}]   ;;  %s3921_s6 = inlined_call_operand.vmem [shape: bf16[128,2048], index: 6, kind: input, shape index: {}]   ;;  %s3922_s7 = inlined_call_operand.vmem [shape: f32[16,2048], index: 7, kind: output, shape index: {0}]   ;;  %s3923_s8 = inlined_call_operand.vmem [shape: f32[2,16,128], index: 8, kind: output, shape index: {1}]   ;;  %s3924_s9 = inlined_call_operand.vmem [shape: f32[2,16,128], index: 9, kind: output, shape index: {2}]  }
   0x1   :  { %s3180_s11 = smov 0   ;;  %s3182_s12 = smov 0  }
   0x2   :  { %s3184_s13 = smov 0  }
   0x3 LB: > { %s32_s14 = sadd.s32 1, %s3119_s12  ;;  %s2545_s15 = sadd.s32 4294967295, %s3123_s13   ;;  %s3123_s13 = sphi %s3184_s13, %s20_s13   ;;  %s3119_s12 = sphi %s3182_s12, %s3929_s12   ;;  %s3115_s11 = sphi %s3180_s11, %s3928_s11   ;;  %s3111_s10 = sphi %s3178_s10, %s3927_s10   ;;  %s3107_s30 = sphi %s3176_s30, %s3926_s30  }
   0x4   : > { %p34_p0 = scmp.ge.s32.totalorder %s32_s14, 2  ;;  %p174_p1 = scmp.ne.s32.totalorder %s3111_s10, %s3107_s30 }
   0x5   : > { %p175_p2 = scmp.eq.s32.totalorder %s3123_s13, 0  ;;  %p206_p4 = scmp.eq.s32.totalorder %s2545_s15, 1 }
   0x6   : > { %s3931_s14 = smov (%p34_p0, %s32_s14), 0  ;;  %s167_s17 = sadd.s32 1, %s3111_s10 }
   0x7   : > { %p176_p3 = por %p175_p2, %p174_p1  ;;  %s164_s16 = ssub.s32 %s3119_s12, %s3931_s14 }
   0x8   : > { %p165_p5 = scmp.eq.s32.totalorder %s164_s16, 0  ;;  %p3211_p6 = por %p206_p4, %p174_p1 }
   0x9   : > { %p2548_p7 = scmp.ge.s32.totalorder %s3123_s13, 2 }
   0xa   : > { %s3216_s19 = scalar_select %p165_p5, %s3111_s10, %s167_s17  }
   0xb   : > { %298 = sbr.rel (%p2548_p7) target bundleno = 52 (0x34), region = 40 }
  0x10   : > { %301 = sbr.rel (!%p176_p3) target bundleno = 52 (0x34), region = 44  ;;  %s303_s20 = sand.u32 (%p176_p3), 1, %s3111_s10  }
  0x11   : > { %s2747_s21 = sshll.u32 (%p176_p3), %s3119_s12, 5  ;;  %s2549_s22 = sshll.u32 (%p176_p3), %s303_s20, 9 }
  0x12   : > { %s3224_s25 = scalar_lea.vmem (%p176_p3), %s3921_s6, %s2747_s21  ;;  %s3229_s26 = scalar_lea.vmem (%p176_p3), [#allocation3], %s2549_s22 }
  0x13   : > { %v322_v0 = vld [vmem:[%s3224_s25] sm:$0xff] (%p176_p3)  ;;  %v324_v1 = vld [vmem:[%s3224_s25 + $0x8] sm:$0xff] (%p176_p3)  ;;  %v326_v2 = vld [vmem:[%s3224_s25 + $0x10] sm:$0xff] (%p176_p3) }
  0x14   : > { %323 = vst [vmem:[%s3229_s26] sm:$0xff] (%p176_p3), %v322_v0  ;;  %325 = vst [vmem:[%s3229_s26 + $0x8] sm:$0xff] (%p176_p3), %v324_v1  ;;  %v328_v3 = vld [vmem:[%s3224_s25 + $0x18] sm:$0xff] (%p176_p3)  ;;  %v330_v4 = vld [vmem:[%s3224_s25 + $0x40] sm:$0xff] (%p176_p3) }
  0x15   : > { %327 = vst [vmem:[%s3229_s26 + $0x10] sm:$0xff] %v326_v2  ;;  %v332_v5 = vld [vmem:[%s3224_s25 + $0x48] sm:$0xff]  ;;  %329 = vst [vmem:[%s3229_s26 + $0x18] sm:$0xff] %v328_v3  ;;  %v334_v6 = vld [vmem:[%s3224_s25 + $0x50] sm:$0xff] }
  0x16   : > { %331 = vst [vmem:[%s3229_s26 + $0x20] sm:$0xff] %v330_v4  ;;  %333 = vst [vmem:[%s3229_s26 + $0x28] sm:$0xff] %v332_v5  ;;  %v336_v7 = vld [vmem:[%s3224_s25 + $0x58] sm:$0xff]  ;;  %v338_v8 = vld [vmem:[%s3224_s25 + $0x80] sm:$0xff] }
  0x17   : > { %335 = vst [vmem:[%s3229_s26 + $0x30] sm:$0xff] %v334_v6  ;;  %337 = vst [vmem:[%s3229_s26 + $0x38] sm:$0xff] %v336_v7  ;;  %v340_v9 = vld [vmem:[%s3224_s25 + $0x88] sm:$0xff]  ;;  %v342_v10 = vld [vmem:[%s3224_s25 + $0x90] sm:$0xff] }
  0x18   : > { %339 = vst [vmem:[%s3229_s26 + $0x40] sm:$0xff] %v338_v8  ;;  %v344_v11 = vld [vmem:[%s3224_s25 + $0x98] sm:$0xff]  ;;  %341 = vst [vmem:[%s3229_s26 + $0x48] sm:$0xff] %v340_v9  ;;  %v346_v12 = vld [vmem:[%s3224_s25 + $0xc0] sm:$0xff] }
  0x19   : > { %343 = vst [vmem:[%s3229_s26 + $0x50] sm:$0xff] %v342_v10  ;;  %345 = vst [vmem:[%s3229_s26 + $0x58] sm:$0xff] %v344_v11  ;;  %v348_v13 = vld [vmem:[%s3224_s25 + $0xc8] sm:$0xff]  ;;  %v350_v14 = vld [vmem:[%s3224_s25 + $0xd0] sm:$0xff] }
  0x1a   : > { %347 = vst [vmem:[%s3229_s26 + $0x60] sm:$0xff] %v346_v12  ;;  %349 = vst [vmem:[%s3229_s26 + $0x68] sm:$0xff] %v348_v13  ;;  %v352_v15 = vld [vmem:[%s3224_s25 + $0xd8] sm:$0xff]  ;;  %v354_v16 = vld [vmem:[%s3224_s25 + $0x100] sm:$0xff] }
  0x1b   : > { %351 = vst [vmem:[%s3229_s26 + $0x70] sm:$0xff] %v350_v14  ;;  %v356_v17 = vld [vmem:[%s3224_s25 + $0x108] sm:$0xff]  ;;  %353 = vst [vmem:[%s3229_s26 + $0x78] sm:$0xff] %v352_v15  ;;  %v358_v18 = vld [vmem:[%s3224_s25 + $0x110] sm:$0xff] }
  0x1c   : > { %355 = vst [vmem:[%s3229_s26 + $0x80] sm:$0xff] %v354_v16  ;;  %357 = vst [vmem:[%s3229_s26 + $0x88] sm:$0xff] %v356_v17  ;;  %v360_v19 = vld [vmem:[%s3224_s25 + $0x118] sm:$0xff]  ;;  %v362_v20 = vld [vmem:[%s3224_s25 + $0x140] sm:$0xff] }
  0x1d   : > { %359 = vst [vmem:[%s3229_s26 + $0x90] sm:$0xff] %v358_v18  ;;  %361 = vst [vmem:[%s3229_s26 + $0x98] sm:$0xff] %v360_v19  ;;  %v364_v21 = vld [vmem:[%s3224_s25 + $0x148] sm:$0xff]  ;;  %v366_v22 = vld [vmem:[%s3224_s25 + $0x150] sm:$0xff] }
  0x1e   : > { %363 = vst [vmem:[%s3229_s26 + $0xa0] sm:$0xff] %v362_v20  ;;  %v368_v23 = vld [vmem:[%s3224_s25 + $0x158] sm:$0xff]  ;;  %365 = vst [vmem:[%s3229_s26 + $0xa8] sm:$0xff] %v364_v21  ;;  %v370_v24 = vld [vmem:[%s3224_s25 + $0x180] sm:$0xff] }
  0x1f   : > { %367 = vst [vmem:[%s3229_s26 + $0xb0] sm:$0xff] %v366_v22  ;;  %369 = vst [vmem:[%s3229_s26 + $0xb8] sm:$0xff] %v368_v23  ;;  %v372_v25 = vld [vmem:[%s3224_s25 + $0x188] sm:$0xff]  ;;  %v374_v26 = vld [vmem:[%s3224_s25 + $0x190] sm:$0xff] }
  0x20   : > { %371 = vst [vmem:[%s3229_s26 + $0xc0] sm:$0xff] %v370_v24  ;;  %373 = vst [vmem:[%s3229_s26 + $0xc8] sm:$0xff] %v372_v25  ;;  %v376_v27 = vld [vmem:[%s3224_s25 + $0x198] sm:$0xff]  ;;  %v378_v28 = vld [vmem:[%s3224_s25 + $0x1c0] sm:$0xff] }
  0x21   : > { %375 = vst [vmem:[%s3229_s26 + $0xd0] sm:$0xff] %v374_v26  ;;  %v380_v29 = vld [vmem:[%s3224_s25 + $0x1c8] sm:$0xff]  ;;  %377 = vst [vmem:[%s3229_s26 + $0xd8] sm:$0xff] %v376_v27  ;;  %v382_v30 = vld [vmem:[%s3224_s25 + $0x1d0] sm:$0xff] }
  0x22   : > { %379 = vst [vmem:[%s3229_s26 + $0xe0] sm:$0xff] %v378_v28  ;;  %381 = vst [vmem:[%s3229_s26 + $0xe8] sm:$0xff] %v380_v29  ;;  %v384_v31 = vld [vmem:[%s3224_s25 + $0x1d8] sm:$0xff]  ;;  %v386_v32 = vld [vmem:[%s3224_s25 + $0x200] sm:$0xff] }
  0x23   : > { %383 = vst [vmem:[%s3229_s26 + $0xf0] sm:$0xff] %v382_v30  ;;  %385 = vst [vmem:[%s3229_s26 + $0xf8] sm:$0xff] %v384_v31  ;;  %v388_v33 = vld [vmem:[%s3224_s25 + $0x208] sm:$0xff]  ;;  %v390_v34 = vld [vmem:[%s3224_s25 + $0x210] sm:$0xff] }
  0x24   : > { %387 = vst [vmem:[%s3229_s26 + $0x100] sm:$0xff] %v386_v32  ;;  %v392_v35 = vld [vmem:[%s3224_s25 + $0x218] sm:$0xff]  ;;  %389 = vst [vmem:[%s3229_s26 + $0x108] sm:$0xff] %v388_v33  ;;  %v394_v36 = vld [vmem:[%s3224_s25 + $0x240] sm:$0xff] }
  0x25   : > { %391 = vst [vmem:[%s3229_s26 + $0x110] sm:$0xff] %v390_v34  ;;  %393 = vst [vmem:[%s3229_s26 + $0x118] sm:$0xff] %v392_v35  ;;  %v396_v37 = vld [vmem:[%s3224_s25 + $0x248] sm:$0xff]  ;;  %v398_v38 = vld [vmem:[%s3224_s25 + $0x250] sm:$0xff] }
  0x26   : > { %395 = vst [vmem:[%s3229_s26 + $0x120] sm:$0xff] %v394_v36  ;;  %397 = vst [vmem:[%s3229_s26 + $0x128] sm:$0xff] %v396_v37  ;;  %v400_v39 = vld [vmem:[%s3224_s25 + $0x258] sm:$0xff]  ;;  %v402_v40 = vld [vmem:[%s3224_s25 + $0x280] sm:$0xff] }
  0x27   : > { %399 = vst [vmem:[%s3229_s26 + $0x130] sm:$0xff] %v398_v38  ;;  %v404_v41 = vld [vmem:[%s3224_s25 + $0x288] sm:$0xff]  ;;  %401 = vst [vmem:[%s3229_s26 + $0x138] sm:$0xff] %v400_v39  ;;  %v406_v42 = vld [vmem:[%s3224_s25 + $0x290] sm:$0xff] }
  0x28   : > { %403 = vst [vmem:[%s3229_s26 + $0x140] sm:$0xff] %v402_v40  ;;  %405 = vst [vmem:[%s3229_s26 + $0x148] sm:$0xff] %v404_v41  ;;  %v408_v43 = vld [vmem:[%s3224_s25 + $0x298] sm:$0xff]  ;;  %v410_v44 = vld [vmem:[%s3224_s25 + $0x2c0] sm:$0xff] }
  0x29   : > { %407 = vst [vmem:[%s3229_s26 + $0x150] sm:$0xff] %v406_v42  ;;  %409 = vst [vmem:[%s3229_s26 + $0x158] sm:$0xff] %v408_v43  ;;  %v412_v45 = vld [vmem:[%s3224_s25 + $0x2c8] sm:$0xff]  ;;  %v414_v46 = vld [vmem:[%s3224_s25 + $0x2d0] sm:$0xff] }
  0x2a   : > { %411 = vst [vmem:[%s3229_s26 + $0x160] sm:$0xff] %v410_v44  ;;  %v416_v47 = vld [vmem:[%s3224_s25 + $0x2d8] sm:$0xff]  ;;  %413 = vst [vmem:[%s3229_s26 + $0x168] sm:$0xff] %v412_v45  ;;  %v418_v48 = vld [vmem:[%s3224_s25 + $0x300] sm:$0xff] }
  0x2b   : > { %415 = vst [vmem:[%s3229_s26 + $0x170] sm:$0xff] %v414_v46  ;;  %417 = vst [vmem:[%s3229_s26 + $0x178] sm:$0xff] %v416_v47  ;;  %v420_v49 = vld [vmem:[%s3224_s25 + $0x308] sm:$0xff]  ;;  %v422_v50 = vld [vmem:[%s3224_s25 + $0x310] sm:$0xff] }
  0x2c   : > { %419 = vst [vmem:[%s3229_s26 + $0x180] sm:$0xff] %v418_v48  ;;  %421 = vst [vmem:[%s3229_s26 + $0x188] sm:$0xff] %v420_v49  ;;  %v424_v51 = vld [vmem:[%s3224_s25 + $0x318] sm:$0xff]  ;;  %v426_v52 = vld [vmem:[%s3224_s25 + $0x340] sm:$0xff] }
  0x2d   : > { %423 = vst [vmem:[%s3229_s26 + $0x190] sm:$0xff] %v422_v50  ;;  %v428_v53 = vld [vmem:[%s3224_s25 + $0x348] sm:$0xff]  ;;  %425 = vst [vmem:[%s3229_s26 + $0x198] sm:$0xff] %v424_v51  ;;  %v430_v54 = vld [vmem:[%s3224_s25 + $0x350] sm:$0xff] }
  0x2e   : > { %427 = vst [vmem:[%s3229_s26 + $0x1a0] sm:$0xff] %v426_v52  ;;  %429 = vst [vmem:[%s3229_s26 + $0x1a8] sm:$0xff] %v428_v53  ;;  %v432_v55 = vld [vmem:[%s3224_s25 + $0x358] sm:$0xff]  ;;  %v434_v56 = vld [vmem:[%s3224_s25 + $0x380] sm:$0xff] }
  0x2f   : > { %431 = vst [vmem:[%s3229_s26 + $0x1b0] sm:$0xff] %v430_v54  ;;  %433 = vst [vmem:[%s3229_s26 + $0x1b8] sm:$0xff] %v432_v55  ;;  %v436_v57 = vld [vmem:[%s3224_s25 + $0x388] sm:$0xff]  ;;  %v438_v58 = vld [vmem:[%s3224_s25 + $0x390] sm:$0xff] }
  0x30   : > { %435 = vst [vmem:[%s3229_s26 + $0x1c0] sm:$0xff] %v434_v56  ;;  %v440_v59 = vld [vmem:[%s3224_s25 + $0x398] sm:$0xff]  ;;  %437 = vst [vmem:[%s3229_s26 + $0x1c8] sm:$0xff] %v436_v57  ;;  %v442_v60 = vld [vmem:[%s3224_s25 + $0x3c0] sm:$0xff] }
  0x31   : > { %439 = vst [vmem:[%s3229_s26 + $0x1d0] sm:$0xff] %v438_v58  ;;  %441 = vst [vmem:[%s3229_s26 + $0x1d8] sm:$0xff] %v440_v59  ;;  %v444_v61 = vld [vmem:[%s3224_s25 + $0x3c8] sm:$0xff]  ;;  %v446_v62 = vld [vmem:[%s3224_s25 + $0x3d0] sm:$0xff] }
  0x32   : > { %443 = vst [vmem:[%s3229_s26 + $0x1e0] sm:$0xff] %v442_v60  ;;  %445 = vst [vmem:[%s3229_s26 + $0x1e8] sm:$0xff] %v444_v61  ;;  %v448_v63 = vld [vmem:[%s3224_s25 + $0x3d8] sm:$0xff] }
  0x33   : > { %447 = vst [vmem:[%s3229_s26 + $0x1f0] sm:$0xff] %v446_v62  ;;  %449 = vst [vmem:[%s3229_s26 + $0x1f8] sm:$0xff] %v448_v63 }
  0x34 PF: > { %p2552_p8 = scmp.ge.s32.totalorder %s3123_s13, 1  ;;  %p454_p9 = scmp.lt.s32.totalorder %s3123_s13, 3 }
  0x36   : > { %p455_p10 = pnand %p2552_p8, %p454_p9 }
  0x37   : > { %s461_s23 = sand.u32 (!%p455_p10), 1, %s3107_s30   ;;  %p509_p11 = scmp.lt.s32.totalorder (!%p455_p10), %s3115_s11, 1 }
  0x38   : > { %458 = sbr.rel (%p455_p10) target bundleno = 739 (0x2e3), region = 67  ;;  %s2553_s24 = sshll.u32 (!%p455_p10), %s461_s23, 9 }
  0x39   : > { %s3716_s25 = scalar_lea.vmem (!%p455_p10), [#allocation3], %s2553_s24  ;;  %s2554_s24 = sshll.u32 (!%p455_p10), %s461_s23, 7 }
  0x3d   : > { %v2949_v0 = vld [vmem:[%s3917_s2 + $0x78] sm:$0xff]   ;;  %v2953_v4 = vld [vmem:[%s3917_s2 + $0x70] sm:$0xff]   ;;  %v2957_v8 = vld [vmem:[%s3917_s2 + $0x68] sm:$0xff]   ;;  %s3824_s28 = scalar_select %p509_p11, %s3115_s11, 1 }
  0x3e   : > { %v2950_v1 = vld [vmem:[%s3917_s2 + $0x38] sm:$0xff]   ;;  %2758 = vmatprep.subr.bf16.mxu0 %v2949_v0  ;;  %v2954_v5 = vld [vmem:[%s3917_s2 + $0x30] sm:$0xff]   ;;  %v2958_v9 = vld [vmem:[%s3917_s2 + $0x28] sm:$0xff]   ;;  %s2752_s30 = sshll.u32 (%p3211_p6), %s3115_s11, 6 }
  0x3f   : > { %v2951_v2 = vld [vmem:[%s3917_s2 + $0xf8] sm:$0xff]   ;;  %2759 = vmatpush3.bf16.msra.mxu0 %v2950_v1  ;;  %v2955_v6 = vld [vmem:[%s3917_s2 + $0xf0] sm:$0xff]   ;;  %v2959_v10 = vld [vmem:[%s3917_s2 + $0xe8] sm:$0xff]   ;;  %s2748_s29 = sshll.u32 %s3824_s28, 4  ;;  %s2374_s27 = scalar_lea.vmem (%p3211_p6), %s3922_s7, %s2752_s30 }
  0x40   : > { %v2952_v3 = vld [vmem:[%s3917_s2 + $0xb8] sm:$0xff]   ;;  %2780 = vmatprep.subr.bf16.mxu1 %v2951_v2  ;;  %2760 = vmatprep.subr.bf16.mxu0 %v2953_v4  ;;  %v2956_v7 = vld [vmem:[%s3917_s2 + $0xb0] sm:$0xff]   ;;  %v2960_v11 = vld [vmem:[%s3917_s2 + $0xa8] sm:$0xff]   ;;  %s3839_s17 = scalar_lea.vmem %s3923_s8, %s2748_s29  ;;  %s518_s22 = scalar_lea.vmem %s3924_s9, %s2748_s29 }
  0x41   : > { %2781 = vmatpush3.bf16.msra.mxu1 %v2952_v3  ;;  %v2961_v12 = vld [vmem:[%s3917_s2 + $0x60] sm:$0xff]   ;;  %v2965_v16 = vld [vmem:[%s3917_s2 + $0x58] sm:$0xff]   ;;  %v2969_v20 = vld [vmem:[%s3917_s2 + $0x50] sm:$0xff]  }
  0x42   : > { %2782 = vmatprep.subr.bf16.mxu1 %v2955_v6  ;;  %v2962_v13 = vld [vmem:[%s3917_s2 + $0x20] sm:$0xff]   ;;  %v2966_v17 = vld [vmem:[%s3917_s2 + $0x18] sm:$0xff]   ;;  %v2970_v21 = vld [vmem:[%s3917_s2 + $0x10] sm:$0xff]  }
  0x43   : > { %2761 = vmatpush3.bf16.msra.mxu0 %v2954_v5  ;;  %v2963_v14 = vld [vmem:[%s3917_s2 + $0xe0] sm:$0xff]   ;;  %v2967_v18 = vld [vmem:[%s3917_s2 + $0xd8] sm:$0xff]   ;;  %v2971_v22 = vld [vmem:[%s3917_s2 + $0xd0] sm:$0xff]  }
  0x44   : > { %2762 = vmatprep.subr.bf16.mxu0 %v2957_v8  ;;  %v2964_v15 = vld [vmem:[%s3917_s2 + $0xa0] sm:$0xff]   ;;  %v2968_v19 = vld [vmem:[%s3917_s2 + $0x98] sm:$0xff]   ;;  %v2972_v23 = vld [vmem:[%s3917_s2 + $0x90] sm:$0xff]  }
  0x45   : > { %2783 = vmatpush3.bf16.msra.mxu1 %v2956_v7  ;;  %v2973_v24 = vld [vmem:[%s3917_s2 + $0x48] sm:$0xff]   ;;  %v2977_v28 = vld [vmem:[%s3917_s2 + $0x40] sm:$0xff]   ;;  %v2984_v34 = vld [vmem:[%s3917_s2 + $0x178] sm:$0xff]  }
  0x46   : > { %2784 = vmatprep.subr.bf16.mxu1 %v2959_v10  ;;  %v2974_v25 = vld [vmem:[%s3917_s2 + $0x8] sm:$0xff]   ;;  %v2978_v29 = vld [vmem:[%s3917_s2] sm:$0xff]   ;;  %v2988_v37 = vld [vmem:[%s3917_s2 + $0x138] sm:$0xff]  }
  0x47   : > { %2763 = vmatpush3.bf16.msra.mxu0 %v2958_v9  ;;  %v2975_v26 = vld [vmem:[%s3917_s2 + $0xc8] sm:$0xff]   ;;  %v2979_v30 = vld [vmem:[%s3917_s2 + $0xc0] sm:$0xff]   ;;  %v2989_v38 = vld [vmem:[%s3919_s4 + $0x78] sm:$0xff]  }
  0x48   : > { %2764 = vmatprep.subr.bf16.mxu0 %v2961_v12  ;;  %v2976_v27 = vld [vmem:[%s3917_s2 + $0x88] sm:$0xff]   ;;  %v2980_v31 = vld [vmem:[%s3915_s0] ss:$24 sps:$4 sm:$0xff]   ;;  %v2982_v32 = vld [vmem:[%s3915_s0 + $0x4] ss:$24 sps:$4 sm:$0xff]  }
  0x49   : > { %2785 = vmatpush3.bf16.msra.mxu1 %v2960_v11  ;;  %v2983_v33 = vld [vmem:[%s3917_s2 + $0x80] sm:$0xff]   ;;  %983 = vmatprep.mubr.bf16.mxu0 %v2982_v32  ;;  %v2990_v39 = vld [vmem:[%s3919_s4 + $0x38] sm:$0xff]   ;;  %v2991_v40 = vld [vmem:[%s3917_s2 + $0x170] sm:$0xff]  }
  0x4a   : > { %2786 = vmatprep.subr.bf16.mxu1 %v2963_v14  ;;  %v2985_v35 = vld [vmem:[%s3915_s0 + $0x8] ss:$24 sps:$4 sm:$0xff]   ;;  %v2987_v36 = vld [vmem:[%s3915_s0 + $0xc] ss:$24 sps:$4 sm:$0xff]   ;;  %v2992_v41 = vld [vmem:[%s3917_s2 + $0x130] sm:$0xff]  }
  0x4b   : > { %2765 = vmatpush3.bf16.msra.mxu0 %v2962_v13  ;;  %1024 = vmatprep.mubr.bf16.mxu1 %v2987_v36  ;;  %v2993_v42 = vld [vmem:[%s3919_s4 + $0x70] sm:$0xff]   ;;  %v2995_v44 = vld [vmem:[%s3917_s2 + $0x168] sm:$0xff]   ;;  %v2999_v48 = vld [vmem:[%s3917_s2 + $0x160] sm:$0xff]  }
  0x4c   : > { %2766 = vmatprep.subr.bf16.mxu0 %v2965_v16  ;;  %v2994_v43 = vld [vmem:[%s3919_s4 + $0x30] sm:$0xff]   ;;  %v2996_v45 = vld [vmem:[%s3917_s2 + $0x128] sm:$0xff]   ;;  %v3000_v49 = vld [vmem:[%s3917_s2 + $0x120] sm:$0xff]  }
  0x4d   : > { %2787 = vmatpush3.bf16.msra.mxu1 %v2964_v15  ;;  %v2997_v46 = vld [vmem:[%s3919_s4 + $0x68] sm:$0xff]   ;;  %v3001_v50 = vld [vmem:[%s3919_s4 + $0x60] sm:$0xff]   ;;  %v3003_v52 = vld [vmem:[%s3917_s2 + $0x158] sm:$0xff]  }
  0x4e   : > { %2788 = vmatprep.subr.bf16.mxu1 %v2967_v18  ;;  %v2998_v47 = vld [vmem:[%s3919_s4 + $0x28] sm:$0xff]   ;;  %v3002_v51 = vld [vmem:[%s3919_s4 + $0x20] sm:$0xff]   ;;  %v3004_v53 = vld [vmem:[%s3917_s2 + $0x118] sm:$0xff]  }
  0x4f   : > { %2767 = vmatpush3.bf16.msra.mxu0 %v2966_v17  ;;  %v3005_v54 = vld [vmem:[%s3919_s4 + $0x58] sm:$0xff]   ;;  %v3007_v56 = vld [vmem:[%s3917_s2 + $0x150] sm:$0xff]   ;;  %v3011_v60 = vld [vmem:[%s3917_s2 + $0x148] sm:$0xff]  }
  0x50   : > { %2768 = vmatprep.subr.bf16.mxu0 %v2969_v20  ;;  %v3006_v55 = vld [vmem:[%s3919_s4 + $0x18] sm:$0xff]   ;;  %v3008_v57 = vld [vmem:[%s3917_s2 + $0x110] sm:$0xff]   ;;  %v3012_v61 = vld [vmem:[%s3917_s2 + $0x108] sm:$0xff]  }
  0x51   : > { %2789 = vmatpush3.bf16.msra.mxu1 %v2968_v19  ;;  %v3009_v58 = vld [vmem:[%s3919_s4 + $0x50] sm:$0xff]   ;;  %v3013_v62 = vld [vmem:[%s3919_s4 + $0x48] sm:$0xff]   ;;  %v3015_v0 = vld [vmem:[%s3917_s2 + $0x140] sm:$0xff]  }
  0x52   : > { %2790 = vmatprep.subr.bf16.mxu1 %v2971_v22  ;;  %v3010_v59 = vld [vmem:[%s3919_s4 + $0x10] sm:$0xff]   ;;  %v3014_v63 = vld [vmem:[%s3919_s4 + $0x8] sm:$0xff]   ;;  %v3016_v1 = vld [vmem:[%s3917_s2 + $0x100] sm:$0xff]  }
  0x53   : > { %2769 = vmatpush3.bf16.msra.mxu0 %v2970_v21  ;;  %v3017_v2 = vld [vmem:[%s3919_s4 + $0x40] sm:$0xff]   ;;  %v3018_v3 = vld [vmem:[%s3915_s0 + $0x10] ss:$24 sps:$4 sm:$0xff]   ;;  %v3020_v4 = vld [vmem:[%s3915_s0 + $0x14] ss:$24 sps:$4 sm:$0xff]  }
  0x54   : > { %2770 = vmatprep.subr.bf16.mxu0 %v2973_v24  ;;  %v3021_v5 = vld [vmem:[%s3919_s4] sm:$0xff]   ;;  %v3022_v6 = vld [vmem:[%s3919_s4 + $0xf8] sm:$0xff]   ;;  %v3029_v12 = vld [vmem:[%s3919_s4 + $0xf0] sm:$0xff]  }
  0x55   : > { %2791 = vmatpush3.bf16.msra.mxu1 %v2972_v23  ;;  %v3023_v7 = vld [vmem:[%s3919_s4 + $0xb8] sm:$0xff]   ;;  %v3030_v13 = vld [vmem:[%s3919_s4 + $0xb0] sm:$0xff]   ;;  %v3033_v16 = vld [vmem:[%s3919_s4 + $0xe8] sm:$0xff]  }
  0x56   : > { %2792 = vmatprep.subr.bf16.mxu1 %v2975_v26  ;;  %v3024_v8 = vld [vmem:[%s3916_s1] ss:$24 sps:$4 sm:$0xff]   ;;  %v3026_v9 = vld [vmem:[%s3916_s1 + $0x4] ss:$24 sps:$4 sm:$0xff]   ;;  %v3031_v14 = vld [vmem:[%s3919_s4 + $0x170] sm:$0xff]  }
  0x57   : > { %2771 = vmatpush3.bf16.msra.mxu0 %v2974_v25  ;;  %v3027_v10 = vld [vmem:[%s3919_s4 + $0x178] sm:$0xff]   ;;  %v3032_v15 = vld [vmem:[%s3919_s4 + $0x130] sm:$0xff]   ;;  %v3034_v17 = vld [vmem:[%s3919_s4 + $0xa8] sm:$0xff]  }
  0x58   : > { %2772 = vmatprep.subr.bf16.mxu0 %v2977_v28  ;;  %v3028_v11 = vld [vmem:[%s3919_s4 + $0x138] sm:$0xff]   ;;  %v3035_v18 = vld [vmem:[%s3919_s4 + $0x168] sm:$0xff]   ;;  %v3037_v20 = vld [vmem:[%s3919_s4 + $0xe0] sm:$0xff]  }
  0x59   : > { %2793 = vmatpush3.bf16.msra.mxu1 %v2976_v27  ;;  %v3036_v19 = vld [vmem:[%s3919_s4 + $0x128] sm:$0xff]   ;;  %v3038_v21 = vld [vmem:[%s3919_s4 + $0xa0] sm:$0xff]   ;;  %v3041_v24 = vld [vmem:[%s3919_s4 + $0xd8] sm:$0xff]  }
  0x5a   : > { %2794 = vmatprep.subr.bf16.mxu1 %v2979_v30  ;;  %v3039_v22 = vld [vmem:[%s3919_s4 + $0x160] sm:$0xff]   ;;  %v3042_v25 = vld [vmem:[%s3919_s4 + $0x98] sm:$0xff]   ;;  %v3045_v28 = vld [vmem:[%s3919_s4 + $0xd0] sm:$0xff]  }
  0x5b   : > { %2773 = vmatpush3.bf16.msra.mxu0 %v2978_v29  ;;  %v3040_v23 = vld [vmem:[%s3919_s4 + $0x120] sm:$0xff]   ;;  %v3043_v26 = vld [vmem:[%s3919_s4 + $0x158] sm:$0xff]   ;;  %v3046_v29 = vld [vmem:[%s3919_s4 + $0x90] sm:$0xff]  }
  0x5c   : > { %2802 = vmatprep.subr.bf16.mxu0 %v2984_v34  ;;  %v3044_v27 = vld [vmem:[%s3919_s4 + $0x118] sm:$0xff]   ;;  %v3047_v30 = vld [vmem:[%s3919_s4 + $0x150] sm:$0xff]   ;;  %v3049_v32 = vld [vmem:[%s3919_s4 + $0xc8] sm:$0xff]  }
  0x5d   : > { %2795 = vmatpush3.bf16.msra.mxu1 %v2983_v33  ;;  %v3050_v33 = vld [vmem:[%s3916_s1 + $0x34] ss:$24 sps:$4 sm:$0xff]  }
  0x5e   : > { %984 = vmatmul.mubr.bf16.vlgmr.msra.gmra.mxu0 %v2980_v31  ;;  %2824 = vmatprep.subr.bf16.mxu1 %v2989_v38  ;;  %v3048_v31 = vld [vmem:[%s3919_s4 + $0x110] sm:$0xff]   ;;  %v3052_v34 = vld [vmem:[%s3919_s4 + $0x88] sm:$0xff]   ;;  %v3056_v38 = vld [vmem:[%s3919_s4 + $0xc0] sm:$0xff]  }
  0x5f   : > { %2803 = vmatpush3.bf16.msra.mxu0 %v2988_v37  ;;  %1065 = vmatprep.mubr.bf16.mxu0 %v3020_v4  ;;  %v3054_v36 = vld [vmem:[%s3919_s4 + $0x148] sm:$0xff]  }
  0x60   : > { %1025 = vmatmul.mubr.bf16.vlgmr.msra.gmra.mxu1 %v2985_v35  ;;  %2804 = vmatprep.subr.bf16.mxu0 %v2991_v40  ;;  %v3053_v35 = vld [vmem:[%s3916_s1 + $0x30] ss:$24 sps:$4 sm:$0xff]   ;;  %v3058_v40 = vld [vmem:[%s3919_s4 + $0x140] sm:$0xff]  }
  0x61   : > { %2825 = vmatpush3.bf16.msra.mxu1 %v2990_v39  ;;  %1569 = vmatprep.mubr.bf16.mxu1 %v3026_v9  ;;  %v3055_v37 = vld [vmem:[%s3919_s4 + $0x108] sm:$0xff]   ;;  %v3057_v39 = vld [vmem:[%s3919_s4 + $0x80] sm:$0xff]  }
  0x62   : > { %2826 = vmatprep.subr.bf16.mxu1 %v2993_v42  ;;  %v3061_v42 = vld [vmem:[%s3916_s1 + $0xc] ss:$24 sps:$4 sm:$0xff]  }
  0x63   : > { %2805 = vmatpush3.bf16.msra.mxu0 %v2992_v41  ;;  %v3059_v41 = vld [vmem:[%s3916_s1 + $0x8] ss:$24 sps:$4 sm:$0xff]  }
  0x64   : > { %2806 = vmatprep.subr.bf16.mxu0 %v2995_v44  ;;  %v3063_v44 = vld [vmem:[%s3916_s1 + $0x10] ss:$24 sps:$4 sm:$0xff]  }
  0x65   : > { %2827 = vmatpush3.bf16.msra.mxu1 %v2994_v43  ;;  %v3062_v43 = vld [vmem:[%s3919_s4 + $0x100] sm:$0xff]  }
  0x66   : > { %2828 = vmatprep.subr.bf16.mxu1 %v2997_v46  ;;  %v3066_v46 = vld [vmem:[%s3916_s1 + $0x3c] ss:$24 sps:$4 sm:$0xff]  }
  0x67   : > { %2807 = vmatpush3.bf16.msra.mxu0 %v2996_v45  ;;  %v3065_v45 = vld [vmem:[%s3916_s1 + $0x14] ss:$24 sps:$4 sm:$0xff]  }
  0x68   : > { %2808 = vmatprep.subr.bf16.mxu0 %v2999_v48  ;;  %v3068_v48 = vld [vmem:[%s3916_s1 + $0x38] ss:$24 sps:$4 sm:$0xff]  }
  0x69   : > { %2829 = vmatpush3.bf16.msra.mxu1 %v2998_v47  ;;  %v3069_v47 = vld [vmem:[%s3916_s1 + $0x44] ss:$24 sps:$4 sm:$0xff]  }
  0x6a   : > { %2830 = vmatprep.subr.bf16.mxu1 %v3001_v50 }
  0x6b   : > { %2809 = vmatpush3.bf16.msra.mxu0 %v3000_v49  ;;  %v3071_v49 = vld [vmem:[%s3916_s1 + $0x40] ss:$24 sps:$4 sm:$0xff]  }
  0x6c   : > { %2810 = vmatprep.subr.bf16.mxu0 %v3003_v52 }
  0x6d   : > { %2831 = vmatpush3.bf16.msra.mxu1 %v3002_v51 }
  0x6e   : > { %2832 = vmatprep.subr.bf16.mxu1 %v3005_v54 }
  0x6f   : > { %2811 = vmatpush3.bf16.msra.mxu0 %v3004_v53 }
  0x70   : > { %2812 = vmatprep.subr.bf16.mxu0 %v3007_v56  ;;  %v2559_v56 = vld [vmem:[%s3918_s3] ss:$0 sm:$0xff] }
  0x71   : > { %2833 = vmatpush3.bf16.msra.mxu1 %v3006_v55 }
  0x72   : > { %2834 = vmatprep.subr.bf16.mxu1 %v3009_v58 }
  0x73   : > { %2813 = vmatpush3.bf16.msra.mxu0 %v3008_v57 }
  0x74   : > { %2814 = vmatprep.subr.bf16.mxu0 %v3011_v60 }
  0x75   : > { %2835 = vmatpush3.bf16.msra.mxu1 %v3010_v59 }
  0x76   : > { %2836 = vmatprep.subr.bf16.mxu1 %v3013_v62 }
  0x77   : > { %2815 = vmatpush3.bf16.msra.mxu0 %v3012_v61 }
  0x78   : > { %2816 = vmatprep.subr.bf16.mxu0 %v3015_v0 }
  0x79   : > { %2837 = vmatpush3.bf16.msra.mxu1 %v3014_v63 }
  0x7a   : > { %2838 = vmatprep.subr.bf16.mxu1 %v3017_v2 }
  0x7b   : > { %2817 = vmatpush3.bf16.msra.mxu0 %v3016_v1 }
  0x7c   : > { %2852 = vmatprep.subr.bf16.mxu0 %v3022_v6 }
  0x7d   : > { %2839 = vmatpush3.bf16.msra.mxu1 %v3021_v5 }
  0x7e   : > { %1066 = vmatmul.mubr.bf16.vlgmr.msra.gmra.mxu0 %v3018_v3  ;;  %2880 = vmatprep.subr.bf16.mxu1 %v3027_v10 }
  0x7f   : > { %2853 = vmatpush3.bf16.msra.mxu0 %v3023_v7  ;;  %1618 = vmatprep.mubr.bf16.mxu0 %v3061_v42 }
  0x80   : > { %1570 = vmatmul.mubr.bf16.vlgmr.msra.gmra.mxu1 %v3024_v8  ;;  %2854 = vmatprep.subr.bf16.mxu0 %v3029_v12 }
  0x81   : > { %2881 = vmatpush3.bf16.msra.mxu1 %v3028_v11  ;;  %1577 = vmatprep.mubr.bf16.mxu1 %v3050_v33 }
  0x82   : > { %2882 = vmatprep.subr.bf16.mxu1 %v3031_v14 }
  0x83   : > { %2855 = vmatpush3.bf16.msra.mxu0 %v3030_v13 }
  0x84   : > { %2856 = vmatprep.subr.bf16.mxu0 %v3033_v16  ;;  %v1816_v16 = vld [vmem:[%s3716_s25 + $0x1c0] sm:$0xff] }
  0x85   : > { %2883 = vmatpush3.bf16.msra.mxu1 %v3032_v15 }
  0x86   : > { %2884 = vmatprep.subr.bf16.mxu1 %v3035_v18  ;;  %v1817_v18 = vld [vmem:[%s3716_s25 + $0x1c8] sm:$0xff] }
  0x87   : > { %2857 = vmatpush3.bf16.msra.mxu0 %v3034_v17  ;;  %v1820_v17 = vld [vmem:[%s3716_s25 + $0x1e0] sm:$0xff] }
  0x88   : > { %2858 = vmatprep.subr.bf16.mxu0 %v3037_v20  ;;  %1578 = vmatmul.mubr.bf16.gmra.mxu1 %v3053_v35  ;;  %v1821_v20 = vld [vmem:[%s3716_s25 + $0x1e8] sm:$0xff]  ;;  %v1804_v35 = vld [vmem:[%s3716_s25 + $0x160] sm:$0xff] }
  0x89   : > { %2885 = vmatpush3.bf16.msra.mxu1 %v3036_v19  ;;  %1667 = vmatprep.mubr.bf16.mxu1 %v3065_v45  ;;  %v2735_v19 = vcombine.high %v1816_v16, %v1820_v17  ;;  %v1792_v45 = vld [vmem:[%s3716_s25 + $0x100] sm:$0xff] }
  0x8a   : > { %2886 = vmatprep.subr.bf16.mxu1 %v3039_v22  ;;  %v2736_v22 = vcombine.low %v1817_v18, %v1821_v20 }
  0x8b   : > { %2859 = vmatpush3.bf16.msra.mxu0 %v3038_v21  ;;  %v2734_v21 = vcombine.low %v1816_v16, %v1820_v17  ;;  %v1781_v17 = vld [vmem:[%s3716_s25 + $0xa8] sm:$0xff] }
  0x8c   : > { %2860 = vmatprep.subr.bf16.mxu0 %v3041_v24 }
  0x8d   : > { %2887 = vmatpush3.bf16.msra.mxu1 %v3040_v23  ;;  %v2737_v23 = vcombine.high %v1817_v18, %v1821_v20 }
  0x8e   : > { %2888 = vmatprep.subr.bf16.mxu1 %v3043_v26  ;;  %v1812_v26 = vld [vmem:[%s3716_s25 + $0x1a0] sm:$0xff] }
  0x8f   : > { %2861 = vmatpush3.bf16.msra.mxu0 %v3042_v25  ;;  %v1808_v25 = vld [vmem:[%s3716_s25 + $0x180] sm:$0xff] }
  0x90   : > { %2862 = vmatprep.subr.bf16.mxu0 %v3045_v28  ;;  %v2727_v28 = vcombine.high %v1808_v25, %v1812_v26 }
  0x91   : > { %2889 = vmatpush3.bf16.msra.mxu1 %v3044_v27  ;;  %v1809_v27 = vld [vmem:[%s3716_s25 + $0x188] sm:$0xff] }
  0x92   : > { %2890 = vmatprep.subr.bf16.mxu1 %v3047_v30  ;;  %v2726_v30 = vcombine.low %v1808_v25, %v1812_v26  ;;  %v1769_v25 = vld [vmem:[%s3716_s25 + $0x48] sm:$0xff] }
  0x93   : > { %2863 = vmatpush3.bf16.msra.mxu0 %v3046_v29  ;;  %v1813_v29 = vld [vmem:[%s3716_s25 + $0x1a8] sm:$0xff] }
  0x94   : > { %2864 = vmatprep.subr.bf16.mxu0 %v3049_v32  ;;  %v2729_v32 = vcombine.high %v1809_v27, %v1813_v29 }
  0x95   : > { %2891 = vmatpush3.bf16.msra.mxu1 %v3048_v31  ;;  %v2728_v31 = vcombine.low %v1809_v27, %v1813_v29 }
  0x96   : > { %2892 = vmatprep.subr.bf16.mxu1 %v3054_v36  ;;  %v1801_v36 = vld [vmem:[%s3716_s25 + $0x148] sm:$0xff] }
  0x97   : > { %2865 = vmatpush3.bf16.msra.mxu0 %v3052_v34  ;;  %v1800_v34 = vld [vmem:[%s3716_s25 + $0x140] sm:$0xff] }
  0x98   : > { %2866 = vmatprep.subr.bf16.mxu0 %v3056_v38  ;;  %v1805_v38 = vld [vmem:[%s3716_s25 + $0x168] sm:$0xff] }
  0x99   : > { %2893 = vmatpush3.bf16.msra.mxu1 %v3055_v37  ;;  %v2719_v37 = vcombine.high %v1800_v34, %v1804_v35  ;;  %v2721_v42 = vcombine.high %v1801_v36, %v1805_v38 }
  0x9a   : > { %2894 = vmatprep.subr.bf16.mxu1 %v3058_v40  ;;  %v2718_v40 = vcombine.low %v1800_v34, %v1804_v35 }
  0x9b   : > { %2867 = vmatpush3.bf16.msra.mxu0 %v3057_v39 }
  0x9c   : > { %2150 = vmatprep.subr.bf16.mxu0 %v2735_v19 }
  0x9d   : > { %2895 = vmatpush3.bf16.msra.mxu1 %v3062_v43 }
  0x9e   : > { %1619 = vmatmul.mubr.bf16.vlgmr.msra.gmra.mxu0 %v3059_v41  ;;  %2193 = vmatprep.subr.bf16.mxu1 %v2737_v23  ;;  %v2720_v41 = vcombine.low %v1801_v36, %v1805_v38  ;;  %v1772_v23 = vld [vmem:[%s3716_s25 + $0x60] sm:$0xff]  ;;  %v1761_v38 = vld [vmem:[%s3716_s25 + $0x8] sm:$0xff] }
  0x9f   : > { %1626 = vmatprep.mubr.bf16.mxu0 %v3066_v46  ;;  %2151 = vmatpush1.bf16.msra.mxu0 %v2734_v21  ;;  %v1796_v46 = vld [vmem:[%s3716_s25 + $0x120] sm:$0xff] }
  0xa0   : > { %1668 = vmatmul.mubr.bf16.vlgmr.msra.gmra.mxu1 %v3063_v44  ;;  %2152 = vmatprep.subr.bf16.mxu0 %v2727_v28 }
  0xa1   : > { %1675 = vmatprep.mubr.bf16.mxu1 %v3069_v47  ;;  %2194 = vmatpush1.bf16.msra.mxu1 %v2736_v22  ;;  %v1793_v47 = vld [vmem:[%s3716_s25 + $0x108] sm:$0xff]  ;;  %v1768_v22 = vld [vmem:[%s3716_s25 + $0x40] sm:$0xff] }
  0xa2   : > { %2195 = vmatprep.subr.bf16.mxu1 %v2729_v32  ;;  %v1760_v32 = vld [vmem:[%s3716_s25] sm:$0xff]  ;;  %v2686_v36 = vcombine.low %v1768_v22, %v1772_v23 }
  0xa3   : > { %2153 = vmatpush1.bf16.msra.mxu0 %v2726_v30  ;;  %v2687_v30 = vcombine.high %v1768_v22, %v1772_v23 }
  0xa4   : > { %2154 = vmatprep.subr.bf16.mxu0 %v2719_v37 }
  0xa5   : > { %2196 = vmatpush1.bf16.msra.mxu1 %v2728_v31  ;;  %v1773_v31 = vld [vmem:[%s3716_s25 + $0x68] sm:$0xff] }
  0xa6   : > { %1627 = vmatmul.mubr.bf16.gmra.mxu0 %v3068_v48  ;;  %2197 = vmatprep.subr.bf16.mxu1 %v2721_v42  ;;  %v3738_v48 = vld [vmem:[%s3920_s5] ss:$0 sm:$0xff]  ;;  %v2689_v37 = vcombine.high %v1769_v25, %v1773_v31 }
  0xa7   : > { %2155 = vmatpush1.bf16.msra.mxu0 %v2718_v40  ;;  %v2688_v40 = vcombine.low %v1769_v25, %v1773_v31  ;;  %v1802_v31 = vld [vmem:[%s3716_s25 + $0x150] sm:$0xff] }
  0xa8   : > { %1676 = vmatmul.mubr.bf16.gmra.mxu1 %v3071_v49  ;;  %v2711_v49 = vcombine.high %v1792_v45, %v1796_v46 }
  0xa9   : > { %2198 = vmatpush1.bf16.msra.mxu1 %v2720_v41 }
  0xaa   : > { %2156 = vmatprep.subr.bf16.mxu0 %v2711_v49  ;;  %v3125_v49 = vmov 0  }
  0xab   : > { %2182 = vmatprep.mubr.bf16.mxu0 %v3125_v49  ;;  %2225 = vmatprep.mubr.bf16.mxu1 %v3125_v49 }
 0x11e   : > { %v2774_v50 = vpop.f32.mrf.mxu0 }
 0x120   : > { %v2775_v51 = vpop.f32.mrf.mxu0  ;;  %v2796_v52 = vpop.f32.mrf.mxu1 }
 0x121   : > { %v2776_v55 = vadd.f32 %v2775_v51, %v2774_v50  ;;  %v1797_v50 = vld [vmem:[%s3716_s25 + $0x128] sm:$0xff] }
 0x122   : > { %v2777_v53 = vpop.f32.mrf.mxu0  ;;  %v2797_v54 = vpop.f32.mrf.mxu1 }
 0x123   : > { %v986_v59 = vadd.f32 %v2776_v55, %v2559_v56  ;;  %v2798_v60 = vadd.f32 %v2797_v54, %v2796_v52  ;;  %v2710_v52 = vcombine.low %v1792_v45, %v1796_v46  ;;  %v2713_v54 = vcombine.high %v1793_v47, %v1797_v50 }
 0x124   : > { %v2778_v57 = vpop.f32.mrf.mxu0  ;;  %v2799_v58 = vpop.f32.mrf.mxu1 }
 0x125   : > { %v2779_v61 = vadd.f32 %v2778_v57, %v2777_v53  ;;  %v1027_v1 = vadd.f32 %v2798_v60, %v986_v59  ;;  %v2712_v53 = vcombine.low %v1793_v47, %v1797_v50  ;;  %2199 = vmatprep.subr.bf16.mxu1 %v2713_v54  ;;  %2157 = vmatpush1.bf16.msra.mxu0 %v2710_v52  ;;  %v1784_v57 = vld [vmem:[%s3716_s25 + $0xc0] sm:$0xff]  ;;  %v1785_v59 = vld [vmem:[%s3716_s25 + $0xc8] sm:$0xff] }
 0x126   : > { %v2800_v62 = vpop.f32.mrf.mxu1 }
 0x127   : > { %v989_v2 = vadd.f32 %v2779_v61, %v2559_v56  ;;  %v2801_v3 = vadd.f32 %v2800_v62, %v2799_v58  ;;  %v1788_v58 = vld [vmem:[%s3716_s25 + $0xe0] sm:$0xff]  ;;  %2200 = vmatpush1.bf16.msra.mxu1 %v2712_v53  ;;  %v1789_v62 = vld [vmem:[%s3716_s25 + $0xe8] sm:$0xff] }
 0x128   : > { %v2703_v61 = vcombine.high %v1784_v57, %v1788_v58 }
 0x129   : > { %v1030_v8 = vadd.f32 %v2801_v3, %v989_v2  ;;  %v2704_v2 = vcombine.low %v1785_v59, %v1789_v62  ;;  %v2705_v3 = vcombine.high %v1785_v59, %v1789_v62 }
 0x12a   : > { %2158 = vmatprep.subr.bf16.mxu0 %v2703_v61 }
 0x12b   : > { %2201 = vmatprep.subr.bf16.mxu1 %v2705_v3 }
 0x12c   : > { %2202 = vmatpush1.bf16.msra.mxu1 %v2704_v2 }
 0x13e   : > { %v2818_v63 = vpop.f32.mrf.mxu0 }
 0x140   : > { %v2819_v0 = vpop.f32.mrf.mxu0  ;;  %v2840_v13 = vpop.f32.mrf.mxu1 }
 0x141   : > { %v2820_v4 = vadd.f32 %v2819_v0, %v2818_v63 }
 0x142   : > { %v2821_v5 = vpop.f32.mrf.mxu0  ;;  %v2841_v14 = vpop.f32.mrf.mxu1 }
 0x143   : > { %v3703_v6 = vadd.f32 %v2820_v4, %v1027_v1  ;;  %v2842_v43 = vadd.f32 %v2841_v14, %v2840_v13  ;;  %v2702_v1 = vcombine.low %v1784_v57, %v1788_v58 }
 0x144   : > { %v2822_v7 = vpop.f32.mrf.mxu0  ;;  %v3714_v15 = vpop.f32.mrf.mxu1 }
 0x145   : > { %v2823_v9 = vadd.f32 %v2822_v7, %v2821_v5  ;;  %v1684_v10 = vmul.f32 %v3703_v6, %v3703_v6  ;;  %v1572_v56 = vadd.f32 %v2842_v43, %v3738_v48  ;;  %2159 = vmatpush1.bf16.msra.mxu0 %v2702_v1  ;;  %v1819_v1 = vld [vmem:[%s3716_s25 + $0x1d8] sm:$0xff] }
 0x146   : > { %v3722_v24 = vpop.f32.mrf.mxu1 }
 0x147   : > { %v3707_v11 = vadd.f32 %v2823_v9, %v1030_v8  ;;  %1686 = vadd.xlane.f32.xlu0 %v1684_v10  ;;  %v1776_v9 = vld [vmem:[%s3716_s25 + $0x80] sm:$0xff]  ;;  %v2845_v26 = vadd.f32 %v3722_v24, %v3714_v15 }
 0x148   : > { %v2846_v33 = vpop.f32.mrf.mxu1  ;;  %v1780_v10 = vld [vmem:[%s3716_s25 + $0xa0] sm:$0xff] }
 0x149   : > { %v1685_v12 = vmul.f32 %v3707_v11, %v3707_v11  ;;  %v2695_v16 = vcombine.high %v1776_v9, %v1780_v10  ;;  %v2694_v19 = vcombine.low %v1776_v9, %v1780_v10 }
 0x14a   : > { %v2847_v39 = vpop.f32.mrf.mxu1 }
 0x14b   : > { %1688 = vadd.xlane.f32.xlu0 %v1685_v12  ;;  %v2848_v4 = vadd.f32 %v2847_v39, %v2846_v33  ;;  %v1777_v12 = vld [vmem:[%s3716_s25 + $0x88] sm:$0xff]  ;;  %2160 = vmatprep.subr.bf16.mxu0 %v2695_v16  ;;  %v1764_v33 = vld [vmem:[%s3716_s25 + $0x20] sm:$0xff] }
 0x14c   : > { %v2849_v44 = vpop.f32.mrf.mxu1  ;;  %v2696_v20 = vcombine.low %v1777_v12, %v1781_v17  ;;  %v2697_v21 = vcombine.high %v1777_v12, %v1781_v17  ;;  %2161 = vmatpush1.bf16.msra.mxu0 %v2694_v19  ;;  %v1765_v39 = vld [vmem:[%s3716_s25 + $0x28] sm:$0xff]  ;;  %v2679_v43 = vcombine.high %v1760_v32, %v1764_v33  ;;  %v2678_v53 = vcombine.low %v1760_v32, %v1764_v33 }
 0x14d   : > { %v1580_v27 = vadd.f32 %v2848_v4, %v3738_v48  ;;  %2162 = vmatprep.subr.bf16.mxu0 %v2687_v30  ;;  %v2681_v45 = vcombine.high %v1761_v38, %v1765_v39  ;;  %v1815_v30 = vld [vmem:[%s3716_s25 + $0x1b8] sm:$0xff] }
 0x14e   : > { %v2850_v51 = vpop.f32.mrf.mxu1  ;;  %2203 = vmatprep.subr.bf16.mxu1 %v2697_v21 }
 0x14f   : > { %v2851_v34 = vadd.f32 %v2850_v51, %v2849_v44  ;;  %2204 = vmatpush1.bf16.msra.mxu1 %v2696_v20  ;;  %v1575_v44 = vadd.f32 %v2845_v26, %v3738_v48  ;;  %v1810_v26 = vld [vmem:[%s3716_s25 + $0x190] sm:$0xff] }
 0x150   : > { %2205 = vmatprep.subr.bf16.mxu1 %v2689_v37  ;;  %2163 = vmatpush1.bf16.msra.mxu0 %v2686_v36 }
 0x151   : > { %v1583_v50 = vadd.f32 %v2851_v34, %v3738_v48  ;;  %2164 = vmatprep.subr.bf16.mxu0 %v2679_v43 }
 0x153   : > { %2206 = vmatpush1.bf16.msra.mxu1 %v2688_v40  ;;  %v1795_v40 = vld [vmem:[%s3716_s25 + $0x118] sm:$0xff] }
 0x154   : > { %2207 = vmatprep.subr.bf16.mxu1 %v2681_v45  ;;  %2165 = vmatpush1.bf16.msra.mxu0 %v2678_v53  ;;  %v1791_v53 = vld [vmem:[%s3716_s25 + $0xf8] sm:$0xff] }
 0x15e   : > { %v2868_v55 = vpop.f32.mrf.mxu0 }
 0x160   : > { %v2869_v60 = vpop.f32.mrf.mxu0  ;;  %v2896_v0 = vpop.f32.mrf.mxu1 }
 0x161   : > { %v2870_v63 = vadd.f32 %v2869_v60, %v2868_v55 }
 0x162   : > { %v2871_v5 = vpop.f32.mrf.mxu0  ;;  %v2897_v8 = vpop.f32.mrf.mxu1 }
 0x163   : > { %v1621_v7 = vadd.f32 %v2870_v63, %v1572_v56  ;;  %v2898_v13 = vadd.f32 %v2897_v8, %v2896_v0  ;;  %v2680_v56 = vcombine.low %v1761_v38, %v1765_v39  ;;  %v1818_v63 = vld [vmem:[%s3716_s25 + $0x1d0] sm:$0xff] }
 0x164   : > { %v2872_v14 = vpop.f32.mrf.mxu0  ;;  %v2899_v18 = vpop.f32.mrf.mxu1  ;;  %v1822_v0 = vld [vmem:[%s3716_s25 + $0x1f0] sm:$0xff] }
 0x165   : > { %v3756_v28 = vadd.f32 %v2898_v13, %v1621_v7  ;;  %v2873_v46 = vadd.f32 %v2872_v14, %v2871_v5  ;;  %2208 = vmatpush1.bf16.msra.mxu1 %v2680_v56  ;;  %v2739_v4 = vcombine.high %v1818_v63, %v1822_v0  ;;  %v1823_v5 = vld [vmem:[%s3716_s25 + $0x1f8] sm:$0xff]  ;;  %v2738_v7 = vcombine.low %v1818_v63, %v1822_v0 }
 0x166   : > { %v2874_v29 = vpop.f32.mrf.mxu0  ;;  %v2900_v35 = vpop.f32.mrf.mxu1  ;;  %v2740_v8 = vcombine.low %v1819_v1, %v1823_v5  ;;  %v2741_v9 = vcombine.high %v1819_v1, %v1823_v5  ;;  %v1771_v5 = vld [vmem:[%s3716_s25 + $0x58] sm:$0xff] }
 0x167   : > { %v1696_v24 = vmul.f32 %v3756_v28, %v3756_v28  ;;  %v1624_v59 = vadd.f32 %v2873_v46, %v1575_v44  ;;  %v2901_v48 = vadd.f32 %v2900_v35, %v2899_v18  ;;  %2236 = vmatprep.subr.bf16.mxu0 %v2739_v4  ;;  %v1807_v35 = vld [vmem:[%s3716_s25 + $0x178] sm:$0xff]  ;;  %v1774_v4 = vld [vmem:[%s3716_s25 + $0x70] sm:$0xff] }
 0x168   : > { %v2875_v15 = vpop.f32.mrf.mxu0  ;;  %v2902_v42 = vpop.f32.mrf.mxu1  ;;  %2279 = vmatprep.subr.bf16.mxu1 %v2741_v9 }
 0x169   : > { %v2876_v41 = vadd.f32 %v2875_v15, %v2874_v29  ;;  %1698 = vadd.xlane.f32.xlu0 %v1696_v24  ;;  %v3777_v10 = vadd.f32 %v2901_v48, %v1624_v59  ;;  %v1811_v29 = vld [vmem:[%s3716_s25 + $0x198] sm:$0xff]  ;;  %v1794_v15 = vld [vmem:[%s3716_s25 + $0x110] sm:$0xff] }
 0x16a   : > { %v2877_v47 = vpop.f32.mrf.mxu0  ;;  %v2903_v52 = vpop.f32.mrf.mxu1  ;;  %v2733_v34 = vcombine.high %v1811_v29, %v1815_v30  ;;  %v2732_v37 = vcombine.low %v1811_v29, %v1815_v30  ;;  %v1798_v24 = vld [vmem:[%s3716_s25 + $0x130] sm:$0xff]  ;;  %v1779_v59 = vld [vmem:[%s3716_s25 + $0x98] sm:$0xff] }
 0x16b   : > { %v1629_v51 = vadd.f32 %v2876_v41, %v1580_v27  ;;  %v2904_v54 = vadd.f32 %v2903_v52, %v2902_v42  ;;  %v1697_v14 = vmul.f32 %v3777_v10, %v3777_v10  ;;  %v1814_v27 = vld [vmem:[%s3716_s25 + $0x1b0] sm:$0xff]  ;;  %v1799_v41 = vld [vmem:[%s3716_s25 + $0x138] sm:$0xff]  ;;  %v2715_v46 = vcombine.high %v1794_v15, %v1798_v24 }
 0x16c   : > { %v2878_v55 = vpop.f32.mrf.mxu0  ;;  %v2905_v58 = vpop.f32.mrf.mxu1  ;;  %v2731_v33 = vcombine.high %v1810_v26, %v1814_v27  ;;  %v2730_v36 = vcombine.low %v1810_v26, %v1814_v27  ;;  %v1787_v52 = vld [vmem:[%s3716_s25 + $0xd8] sm:$0xff] }
 0x16d   : > { %v2879_v57 = vadd.f32 %v2878_v55, %v2877_v47  ;;  %v3769_v60 = vadd.f32 %v2904_v54, %v1629_v51  ;;  %v2717_v47 = vcombine.high %v1795_v40, %v1799_v41  ;;  %v1790_v51 = vld [vmem:[%s3716_s25 + $0xf0] sm:$0xff]  ;;  %v2716_v54 = vcombine.low %v1795_v40, %v1799_v41  ;;  %v1783_v48 = vld [vmem:[%s3716_s25 + $0xb8] sm:$0xff] }
 0x16e   : > { %v2906_v62 = vpop.f32.mrf.mxu1  ;;  %v2709_v56 = vcombine.high %v1787_v52, %v1791_v53  ;;  %v2708_v63 = vcombine.low %v1787_v52, %v1791_v53  ;;  %v1736_v41 = vlaneseq }
 0x16f   : > { %v1632_v61 = vadd.f32 %v2879_v57, %v1583_v50  ;;  %v2907_v2 = vadd.f32 %v2906_v62, %v2905_v58  ;;  %v1708_v3 = vmul.f32 %v3769_v60, %v3769_v60  ;;  %v1786_v50 = vld [vmem:[%s3716_s25 + $0xd0] sm:$0xff] }
 0x170   : > { %v2707_v55 = vcombine.high %v1786_v50, %v1790_v51  ;;  %v1778_v57 = vld [vmem:[%s3716_s25 + $0x90] sm:$0xff]  ;;  %v2706_v62 = vcombine.low %v1786_v50, %v1790_v51 }
 0x171   : > { %v3779_v12 = vadd.f32 %v2907_v2, %v1632_v61  ;;  %1710 = vadd.xlane.f32.xlu1 %v1708_v3  ;;  %v1782_v58 = vld [vmem:[%s3716_s25 + $0xb0] sm:$0xff]  ;;  %v2701_v2 = vcombine.high %v1779_v59, %v1783_v48 }
 0x172   : > { %v2699_v1 = vcombine.high %v1778_v57, %v1782_v58  ;;  %v1770_v3 = vld [vmem:[%s3716_s25 + $0x50] sm:$0xff]  ;;  %v2698_v9 = vcombine.low %v1778_v57, %v1782_v58 }
 0x173   : > { %v1709_v13 = vmul.f32 %v3779_v12, %v3779_v12  ;;  %v2690_v27 = vcombine.low %v1770_v3, %v1774_v4 }
 0x175   : > { %1712 = vadd.xlane.f32.xlu1 %v1709_v13  ;;  %v2700_v13 = vcombine.low %v1779_v59, %v1783_v48 }
 0x179   : > { %1700 = vadd.xlane.f32.xlu1 %v1697_v14 }
 0x1d0   : > { %v1687_v16 = vpop.xlane.xlu0 %1686 }
 0x1d1   : > { %v1690_v17 = vmax.f32 %v1687_v16, 1e-24  ;;  %v2691_v16 = vcombine.high %v1770_v3, %v1774_v4 }
 0x1d3   : > { %3073 = vrsqrt.f32 %v1690_v17 }
 0x1d4   : > { %v1689_v18 = vpop.xlane.xlu0 %1688 }
 0x1d5   : > { %v1691_v19 = vmax.f32 %v1689_v18, 1e-24  ;;  %v1762_v18 = vld [vmem:[%s3716_s25 + $0x10] sm:$0xff] }
 0x1d7   : > { %3075 = vrsqrt.f32 %v1691_v19  ;;  %v1766_v19 = vld [vmem:[%s3716_s25 + $0x30] sm:$0xff] }
 0x1e0   : > { %v3074_v20 = vpop.eup %3073 }
 0x1e1   : > { %v3786_v22 = vmul.f32 %v3074_v20, %v3703_v6  ;;  %v1806_v6 = vld [vmem:[%s3716_s25 + $0x170] sm:$0xff]  ;;  %v1763_v20 = vld [vmem:[%s3716_s25 + $0x18] sm:$0xff] }
 0x1e2   : > { %v2723_v38 = vcombine.high %v1802_v31, %v1806_v6  ;;  %v2722_v43 = vcombine.low %v1802_v31, %v1806_v6  ;;  %v2683_v31 = vcombine.high %v1762_v18, %v1766_v19  ;;  %v2682_v6 = vcombine.low %v1762_v18, %v1766_v19 }
 0x1e4   : > { %v3076_v21 = vpop.eup %3075 }
 0x1e5   : > { %v3789_v23 = vmul.f32 %v3076_v21, %v3707_v11  ;;  %v1803_v11 = vld [vmem:[%s3716_s25 + $0x158] sm:$0xff] }
 0x1e6   : > { %v2725_v39 = vcombine.high %v1803_v11, %v1807_v35  ;;  %v2724_v45 = vcombine.low %v1803_v11, %v1807_v35  ;;  %v1767_v21 = vld [vmem:[%s3716_s25 + $0x38] sm:$0xff] }
 0x1e7   : > { %v2756_v25 = vpack.c.bf16 %v3789_v23, %v3786_v22  ;;  %v2684_v11 = vcombine.low %v1763_v20, %v1767_v21 }
 0x1e9   : > { %2757 = vst [vmem:[#allocation2] sm:$0xff] %v2756_v25  }
 0x1f0   : > { %v3798_v32 = vld [vmem:[#allocation2] sm:$0xff]  }
 0x1f1   : > { %2183 = vmatmul.mubr.bf16.vlgmr.msra.gmra.mxu0 %v3798_v32  ;;  %2226 = vmatmul.mubr.bf16.vlgmr.msra.gmra.mxu1 %v3798_v32 }
 0x1f2   : > { %2237 = vmatpush1.bf16.msra.mxu0 %v2738_v7  ;;  %2280 = vmatpush1.bf16.msra.mxu1 %v2740_v8  ;;  %v1699_v42 = vpop.xlane.xlu0 %1698  ;;  %v1775_v7 = vld [vmem:[%s3716_s25 + $0x78] sm:$0xff]  ;;  %s3860_s25 = scalar_lea.vmem [#allocation4], %s2554_s24 }
 0x1f3   : > { %2238 = vmatprep.subr.bf16.mxu0 %v2731_v33  ;;  %2281 = vmatprep.subr.bf16.mxu1 %v2733_v34  ;;  %v1702_v44 = vmax.f32 %v1699_v42, 1e-24  ;;  %v2693_v17 = vcombine.high %v1771_v5, %v1775_v7  ;;  %v2692_v29 = vcombine.low %v1771_v5, %v1775_v7  ;;  %v2685_v33 = vcombine.high %v1763_v20, %v1767_v21 }
 0x1f4   : > { %2268 = vmatprep.mubr.bf16.mxu0 %v3125_v49  ;;  %2311 = vmatprep.mubr.bf16.mxu1 %v3125_v49  ;;  %v2714_v49 = vcombine.low %v1794_v15, %v1798_v24 }
 0x1f5   : > { %3077 = vrsqrt.f32 %v1702_v44 }
 0x1f6   : > { %2239 = vmatpush1.bf16.msra.mxu0 %v2730_v36  ;;  %2282 = vmatpush1.bf16.msra.mxu1 %v2732_v37 }
 0x1f7   : > { %2240 = vmatprep.subr.bf16.mxu0 %v2723_v38  ;;  %2283 = vmatprep.subr.bf16.mxu1 %v2725_v39 }
 0x1fa   : > { %2241 = vmatpush1.bf16.msra.mxu0 %v2722_v43  ;;  %2284 = vmatpush1.bf16.msra.mxu1 %v2724_v45  ;;  %v1711_v61 = vpop.xlane.xlu1 %1710 }
 0x1fb   : > { %2242 = vmatprep.subr.bf16.mxu0 %v2715_v46  ;;  %2285 = vmatprep.subr.bf16.mxu1 %v2717_v47  ;;  %v1714_v0 = vmax.f32 %v1711_v61, 1e-24 }
 0x1fd   : > { %3079 = vrsqrt.f32 %v1714_v0 }
 0x1fe   : > { %2243 = vmatpush1.bf16.msra.mxu0 %v2714_v49  ;;  %2286 = vmatpush1.bf16.msra.mxu1 %v2716_v54  ;;  %v1713_v8 = vpop.xlane.xlu1 %1712 }
 0x1ff   : > { %2244 = vmatprep.subr.bf16.mxu0 %v2707_v55  ;;  %2287 = vmatprep.subr.bf16.mxu1 %v2709_v56  ;;  %v1715_v14 = vmax.f32 %v1713_v8, 1e-24 }
 0x201   : > { %3081 = vrsqrt.f32 %v1715_v14 }
 0x202   : > { %2245 = vmatpush1.bf16.msra.mxu0 %v2706_v62  ;;  %2288 = vmatpush1.bf16.msra.mxu1 %v2708_v63  ;;  %v3078_v25 = vpop.eup %3077  ;;  %v1701_v26 = vpop.xlane.xlu1 %1700 }
 0x203   : > { %2246 = vmatprep.subr.bf16.mxu0 %v2699_v1  ;;  %2289 = vmatprep.subr.bf16.mxu1 %v2701_v2  ;;  %v1703_v30 = vmax.f32 %v1701_v26, 1e-24  ;;  %v1706_v34 = vmul.f32 %v3078_v25, %v3756_v28 }
 0x205   : > { %3083 = vrsqrt.f32 %v1703_v30  ;;  %1746 = vst [vmem:[%s3839_s17] sm:$0xff] %v1706_v34  ;;  %v1720_v15 = vmul.f32 %v1706_v34, %v3786_v22 }
 0x206   : > { %2247 = vmatpush1.bf16.msra.mxu0 %v2698_v9  ;;  %2290 = vmatpush1.bf16.msra.mxu1 %v2700_v13 }
 0x207   : > { %2248 = vmatprep.subr.bf16.mxu0 %v2691_v16  ;;  %2291 = vmatprep.subr.bf16.mxu1 %v2693_v17 }
 0x20a   : > { %2249 = vmatpush1.bf16.msra.mxu0 %v2690_v27  ;;  %2292 = vmatpush1.bf16.msra.mxu1 %v2692_v29  ;;  %v3080_v35 = vpop.eup %3079 }
 0x20b   : > { %2250 = vmatprep.subr.bf16.mxu0 %v2683_v31  ;;  %2293 = vmatprep.subr.bf16.mxu1 %v2685_v33  ;;  %v1718_v36 = vmul.f32 %v3080_v35, %v3769_v60 }
 0x20d   : > { %v1728_v37 = vmul.f32 %v1718_v36, %v3786_v22 }
 0x20e   : > { %2251 = vmatpush1.bf16.msra.mxu0 %v2682_v6  ;;  %2294 = vmatpush1.bf16.msra.mxu1 %v2684_v11  ;;  %v3082_v28 = vpop.eup %3081 }
 0x20f   : > { %1730 = vadd.xlane.f32.xlu0 %v1728_v37  ;;  %v1719_v38 = vmul.f32 %v3082_v28, %v3779_v12 }
 0x211   : > { %2269 = vmatmul.mubr.bf16.vlgmr.msra.gmra.mxu0 %v3798_v32  ;;  %2312 = vmatmul.mubr.bf16.vlgmr.msra.gmra.mxu1 %v3798_v32  ;;  %v1729_v39 = vmul.f32 %v1719_v38, %v3789_v23  ;;  %v1737_v32 = vand.u32 127, %v1736_v41 }
 0x212   : > { %v3084_v24 = vpop.eup %3083 }
 0x213   : > { %1732 = vadd.xlane.f32.xlu1 %v1729_v39  ;;  %1722 = vadd.xlane.f32.xlu0 %v1720_v15  ;;  %v1707_v60 = vmul.f32 %v3084_v24, %v3777_v10  ;;  %vm1739_vm0 = vcmp.eq.s32.totalorder %v1737_v32, 1  ;;  %vm1738_vm1 = vcmp.eq.s32.totalorder %v1737_v32, 0 }
 0x215   : > { %v1721_v40 = vmul.f32 %v1707_v60, %v3789_v23  ;;  %1747 = vst [vmem:[%s3839_s17 + $0x8] sm:$0xff] %v1707_v60 }
 0x217   : > { %1724 = vadd.xlane.f32.xlu1 %v1721_v40 }
 0x298   : > { %v1731_v42 = vpop.xlane.xlu0 %1730 }
 0x299   : > { %v1734_v43 = vmul.f32 14.285714, %v1731_v42 }
 0x29b   : > { %v1740_v10 = vsel %vm1739_vm0, %v1734_v43, 0.0 }
 0x29c   : > { %v1733_v12 = vpop.xlane.xlu1 %1732  ;;  %v1723_v45 = vpop.xlane.xlu0 %1722 }
 0x29d   : > { %v1726_v22 = vmul.f32 14.285714, %v1723_v45  ;;  %v1735_v44 = vmul.f32 14.285714, %v1733_v12 }
 0x29f   : > { %v1742_v23 = vsel %vm1738_vm1, %v1726_v22, %v1740_v10  ;;  %v1741_v50 = vsel %vm1739_vm0, %v1735_v44, 0.0 }
 0x2a0   : > { %1744 = vst [vmem:[%s518_s22] sm:$0xff] %v1742_v23  ;;  %v1725_v46 = vpop.xlane.xlu1 %1724 }
 0x2a1   : > { %v1727_v47 = vmul.f32 14.285714, %v1725_v46 }
 0x2a3   : > { %v1743_v51 = vsel %vm1738_vm1, %v1727_v47, %v1741_v50 }
 0x2a4   : > { %1745 = vst [vmem:[%s518_s22 + $0x8] sm:$0xff] %v1743_v51 }
 0x2b1   : > { %v2184_v52 = vpop.f32.mrf.mxu0  ;;  %v2227_v53 = vpop.f32.mrf.mxu1 }
 0x2b2   : > { %v2322_v49 = vmul.f32 14.285714, %v2184_v52  ;;  %v2324_v54 = vmul.f32 14.285714, %v2227_v53 }
 0x2b3   : > { %v2186_v55 = vpop.f32.mrf.mxu0  ;;  %v2229_v56 = vpop.f32.mrf.mxu1 }
 0x2b4   : > { %2338 = vst [vmem:[%s3860_s25] sm:$0xff] %v2322_v49  ;;  %2340 = vst [vmem:[%s3860_s25 + $0x10] sm:$0xff] %v2324_v54  ;;  %v2323_v57 = vmul.f32 14.285714, %v2186_v55  ;;  %v2325_v58 = vmul.f32 14.285714, %v2229_v56 }
 0x2b5   : > { %v2188_v59 = vpop.f32.mrf.mxu0  ;;  %v2231_v48 = vpop.f32.mrf.mxu1 }
 0x2b6   : > { %2339 = vst [vmem:[%s3860_s25 + $0x8] sm:$0xff] %v2323_v57  ;;  %2341 = vst [vmem:[%s3860_s25 + $0x18] sm:$0xff] %v2325_v58  ;;  %v2330_v61 = vmul.f32 14.285714, %v2188_v59  ;;  %v2332_v62 = vmul.f32 14.285714, %v2231_v48 }
 0x2b7   : > { %v2190_v63 = vpop.f32.mrf.mxu0  ;;  %v2233_v0 = vpop.f32.mrf.mxu1 }
 0x2b8   : > { %2346 = vst [vmem:[%s3860_s25 + $0x40] sm:$0xff] %v2330_v61  ;;  %2348 = vst [vmem:[%s3860_s25 + $0x50] sm:$0xff] %v2332_v62  ;;  %v2331_v1 = vmul.f32 14.285714, %v2190_v63  ;;  %v2333_v2 = vmul.f32 14.285714, %v2233_v0 }
 0x2ba   : > { %2347 = vst [vmem:[%s3860_s25 + $0x48] sm:$0xff] %v2331_v1  ;;  %2349 = vst [vmem:[%s3860_s25 + $0x58] sm:$0xff] %v2333_v2 }
 0x2bb   : > { %v2387_v27 = vld [vmem:[%s3860_s25] sm:$0xff] (%p3211_p6)  ;;  %v2391_v30 = vld [vmem:[%s3860_s25 + $0x10] sm:$0xff] (%p3211_p6) }
 0x2bc   : > { %2388 = vst [vmem:[%s2374_s27] sm:$0xff] (%p3211_p6), %v2387_v27  ;;  %2392 = vst [vmem:[%s2374_s27 + $0x10] sm:$0xff] (%p3211_p6), %v2391_v30 }
 0x2bd   : > { %v2389_v29 = vld [vmem:[%s3860_s25 + $0x8] sm:$0xff] (%p3211_p6)  ;;  %v2393_v31 = vld [vmem:[%s3860_s25 + $0x18] sm:$0xff] (%p3211_p6) }
 0x2be   : > { %2390 = vst [vmem:[%s2374_s27 + $0x8] sm:$0xff] (%p3211_p6), %v2389_v29  ;;  %2394 = vst [vmem:[%s2374_s27 + $0x18] sm:$0xff] (%p3211_p6), %v2393_v31 }
 0x2bf   : > { %v2403_v35 = vld [vmem:[%s3860_s25 + $0x40] sm:$0xff] (%p3211_p6)  ;;  %v2407_v37 = vld [vmem:[%s3860_s25 + $0x50] sm:$0xff] (%p3211_p6) }
 0x2c0   : > { %2404 = vst [vmem:[%s2374_s27 + $0x80] sm:$0xff] (%p3211_p6), %v2403_v35  ;;  %2408 = vst [vmem:[%s2374_s27 + $0x90] sm:$0xff] (%p3211_p6), %v2407_v37 }
 0x2c1   : > { %v2405_v36 = vld [vmem:[%s3860_s25 + $0x48] sm:$0xff] (%p3211_p6)  ;;  %v2409_v28 = vld [vmem:[%s3860_s25 + $0x58] sm:$0xff] (%p3211_p6) }
 0x2c2   : > { %2406 = vst [vmem:[%s2374_s27 + $0x88] sm:$0xff] (%p3211_p6), %v2405_v36  ;;  %2410 = vst [vmem:[%s2374_s27 + $0x98] sm:$0xff] (%p3211_p6), %v2409_v28 }
 0x2d1   : > { %v2270_v3 = vpop.f32.mrf.mxu0  ;;  %v2313_v4 = vpop.f32.mrf.mxu1 }
 0x2d2   : > { %v2326_v5 = vmul.f32 14.285714, %v2270_v3  ;;  %v2328_v7 = vmul.f32 14.285714, %v2313_v4 }
 0x2d3   : > { %v2272_v8 = vpop.f32.mrf.mxu0  ;;  %v2315_v9 = vpop.f32.mrf.mxu1 }
 0x2d4   : > { %2342 = vst [vmem:[%s3860_s25 + $0x20] sm:$0xff] %v2326_v5  ;;  %2344 = vst [vmem:[%s3860_s25 + $0x30] sm:$0xff] %v2328_v7  ;;  %v2327_v13 = vmul.f32 14.285714, %v2272_v8  ;;  %v2329_v14 = vmul.f32 14.285714, %v2315_v9 }
 0x2d5   : > { %v2274_v16 = vpop.f32.mrf.mxu0  ;;  %v2317_v17 = vpop.f32.mrf.mxu1 }
 0x2d6   : > { %2343 = vst [vmem:[%s3860_s25 + $0x28] sm:$0xff] %v2327_v13  ;;  %2345 = vst [vmem:[%s3860_s25 + $0x38] sm:$0xff] %v2329_v14  ;;  %v2334_v18 = vmul.f32 14.285714, %v2274_v16  ;;  %v2336_v19 = vmul.f32 14.285714, %v2317_v17 }
 0x2d7   : > { %v2276_v20 = vpop.f32.mrf.mxu0  ;;  %v2319_v21 = vpop.f32.mrf.mxu1  ;;  %2370 = sbr.rel (!%p3211_p6) target bundleno = 739 (0x2e3), region = 79 }
 0x2d8   : > { %2350 = vst [vmem:[%s3860_s25 + $0x60] sm:$0xff] %v2334_v18  ;;  %2352 = vst [vmem:[%s3860_s25 + $0x70] sm:$0xff] %v2336_v19  ;;  %v2335_v25 = vmul.f32 14.285714, %v2276_v20  ;;  %v2337_v26 = vmul.f32 14.285714, %v2319_v21 }
 0x2da   : > { %2351 = vst [vmem:[%s3860_s25 + $0x68] sm:$0xff] %v2335_v25  ;;  %2353 = vst [vmem:[%s3860_s25 + $0x78] sm:$0xff] %v2337_v26 }
 0x2db   : > { %v2395_v33 = vld [vmem:[%s3860_s25 + $0x20] sm:$0xff] (%p3211_p6)  ;;  %v2399_v6 = vld [vmem:[%s3860_s25 + $0x30] sm:$0xff] (%p3211_p6) }
 0x2dc   : > { %2396 = vst [vmem:[%s2374_s27 + $0x20] sm:$0xff] %v2395_v33  ;;  %2400 = vst [vmem:[%s2374_s27 + $0x30] sm:$0xff] %v2399_v6 }
 0x2dd   : > { %v2397_v34 = vld [vmem:[%s3860_s25 + $0x28] sm:$0xff]  ;;  %v2401_v11 = vld [vmem:[%s3860_s25 + $0x38] sm:$0xff] }
 0x2de   : > { %2398 = vst [vmem:[%s2374_s27 + $0x28] sm:$0xff] %v2397_v34  ;;  %2402 = vst [vmem:[%s2374_s27 + $0x38] sm:$0xff] %v2401_v11 }
 0x2df   : > { %v2411_v38 = vld [vmem:[%s3860_s25 + $0x60] sm:$0xff]  ;;  %v2415_v15 = vld [vmem:[%s3860_s25 + $0x70] sm:$0xff] }
 0x2e0   : > { %2412 = vst [vmem:[%s2374_s27 + $0xa0] sm:$0xff] %v2411_v38  ;;  %2416 = vst [vmem:[%s2374_s27 + $0xb0] sm:$0xff] %v2415_v15 }
 0x2e1   : > { %v2413_v39 = vld [vmem:[%s3860_s25 + $0x68] sm:$0xff]  ;;  %v2417_v24 = vld [vmem:[%s3860_s25 + $0x78] sm:$0xff] }
 0x2e2   : > { %2414 = vst [vmem:[%s2374_s27 + $0xa8] sm:$0xff] %v2413_v39  ;;  %2418 = vst [vmem:[%s2374_s27 + $0xb8] sm:$0xff] %v2417_v24 }
 0x2e3 PF: > { %s20_s13 = sadd.s32 1, %s3123_s13   ;;  %s3926_s30 = smov %s3111_s10 }
 0x2e4   : > { %p17_p12 = scmp.ge.s32.totalorder %s20_s13, 4   ;;  %s3927_s10 = smov %s3216_s19 }
 0x2e5   : > { %s3928_s11 = smov %s3119_s12  ;;  %s3929_s12 = smov %s3931_s14 }
 0x2e6   :  { %19 = sbr.rel (!%p17_p12) target bundleno = 3 (0x3), region = 157 }

</bundles_post_ra>
